<compile_context>
chip_gen: v6e
topology: v6e:2x2x1
jax: 0.10.0
libtpu: 0.0.40
codegen_flags: <defaults>
</compile_context>

<pallas_src>
import math

import jax
import jax.numpy as jnp
from jax import lax
from jax.experimental import pallas as pl
from jax.experimental.pallas import tpu as pltpu

_LANE = 128
_CHAINS = 8          # chains processed in lockstep per grid step (one sublane tile)


def _round_up(x, m):
    return (x + m - 1) // m * m


def _make_decoder_kernel(num_classes, h_pad, c_pad, n_steps):
    """Decoder kernel for one chain-group: 8 chains in lockstep, serial over steps."""
    unroll = True if n_steps <= 8 else 4
    nbits = (c_pad - 1).bit_length()                 # low bits used for the index
    low_mask = ~((1 << nbits) - 1)

    def kernel(feat_ref, w_ih_f_ref, b_ref, embw_ref, w_hh_ref, w_out_ref,
               b_out_ref, mask_ref, dists_ref, xproj_sc):
        # ---- hoisted, state-independent feature projection (one dense matmul) ----
        xproj_sc[...] = (
            jnp.dot(feat_ref[...].astype(jnp.bfloat16), w_ih_f_ref[...],
                    preferred_element_type=jnp.float32)
            + b_ref[...])

        # ---- loop-invariant values hoisted (no per-iter broadcast_in_dim) ----
        mask_b = jnp.broadcast_to(mask_ref[...], (_CHAINS, h_pad))
        b_out_b = jnp.broadcast_to(b_out_ref[...], (_CHAINS, c_pad))
        col = lax.broadcasted_iota(jnp.int32, (_CHAINS, c_pad), 1)
        invalid = (col == 0) | (col >= num_classes)   # background + lane padding
        rev = (c_pad - 1) - col                        # fits in the low `nbits` bits

        h0 = jnp.zeros((_CHAINS, h_pad), jnp.float32)
        c0 = jnp.zeros((_CHAINS, h_pad), jnp.float32)
        onehot0 = (col == 0).astype(jnp.bfloat16)      # start token = background

        def step(t, carry):
            h_prev, c_prev, onehot_prev = carry
            row0 = pl.multiple_of(t * _CHAINS, _CHAINS)
            xp = xproj_sc[pl.ds(row0, _CHAINS), :]     # (8, 4*H_pad) f32

            # embedding path folded into the gate matmul: two independent MXU pushes
            gates = (jnp.dot(onehot_prev, embw_ref[...],
                             preferred_element_type=jnp.float32)
                     + jnp.dot(h_prev.astype(jnp.bfloat16), w_hh_ref[...],
                               preferred_element_type=jnp.float32)
                     + xp)                              # (8, 4*H_pad) f32

            i_g = jax.nn.sigmoid(gates[:, 0 * h_pad:1 * h_pad])
            f_g = jax.nn.sigmoid(gates[:, 1 * h_pad:2 * h_pad])
            g_g = jnp.tanh(gates[:, 2 * h_pad:3 * h_pad])
            o_g = jax.nn.sigmoid(gates[:, 3 * h_pad:4 * h_pad])

            c_new = f_g * c_prev + i_g * g_g
            h_new = o_g * jnp.tanh(c_new) * mask_b      # dropout mask (tree++chain)

            dists = (jnp.dot(h_new.astype(jnp.bfloat16), w_out_ref[...],
                             preferred_element_type=jnp.float32) + b_out_b)
            dists_ref[pl.ds(row0, _CHAINS), :] = dists  # full (8,128) tile store

            # single-XLU-reduction first-argmax over non-background real classes:
            # monotone int32 key of the float value in high bits, reversed class
            # index in low bits -> unique max lane, smallest index wins ties.
            bits = pltpu.bitcast(dists, jnp.int32)
            sortable = jnp.where(bits < 0, bits ^ jnp.int32(0x7FFFFFFF), bits)
            key = jnp.where(invalid, jnp.int32(-2 ** 31),
                            (sortable & jnp.int32(low_mask)) | rev)
            m = jnp.max(key, axis=-1, keepdims=True)
            onehot_new = (key == m).astype(jnp.bfloat16)

            return (h_new, c_new, onehot_new)

        lax.fori_loop(0, n_steps, step, (h0, c0, onehot0), unroll=unroll)

    return kernel


def decoder_hrtree_lstm_forward(features, params, dropout_mask, batch_size):
    """features: (num_obj, inputs_dim) f32, chain-major (image b owns rows
    b*L .. (b+1)*L-1). Returns (out_dists, out_commitments)."""
    n, din = features.shape
    embed_w = params["embed_w"]                 # (C, E) f32
    num_classes, _ = embed_w.shape
    h = params["w_hh"].shape[0]

    assert n % batch_size == 0, "ragged per-image chains not modeled"
    n_steps = n // batch_size                   # nodes per image (incl. dummy root)
    n_chains = batch_size
    n_groups = pl.cdiv(n_chains, _CHAINS)
    chains_pad = n_groups * _CHAINS

    h_pad = _round_up(h, _LANE)
    c_pad = _round_up(num_classes, _LANE)
    g_pad = 4 * h_pad
    rows_per_group = n_steps * _CHAINS

    def pad_gate_cols(w):
        # (rows, 4H) -> (rows, 4*H_pad): each gate slab at a 128-aligned offset.
        rows = w.shape[0]
        out = jnp.zeros((rows, g_pad), jnp.float32)
        for k in range(4):
            out = out.at[:, k * h_pad:k * h_pad + h].set(w[:, k * h:(k + 1) * h])
        return out

    # ---- weights: bf16 MXU operands, f32 biases ----
    w_ih_f = pad_gate_cols(params["w_ih_f"]).astype(jnp.bfloat16)     # (Din, 4*H_pad)
    b = pad_gate_cols(params["b"])                                    # (1, 4*H_pad)

    # embedding folded into the gate matmul: embW = obj_embed.weight @ W_ih_e
    embw = (jnp.zeros((c_pad, g_pad), jnp.float32)
            .at[:num_classes, :].set(pad_gate_cols(embed_w @ params["w_ih_e"]))
            ).astype(jnp.bfloat16)                                    # (C_pad, 4*H_pad)

    w_hh = (jnp.zeros((h_pad, g_pad), jnp.float32)
            .at[:h, :].set(pad_gate_cols(params["w_hh"]))).astype(jnp.bfloat16)

    w_out = (jnp.zeros((h_pad, c_pad), jnp.float32)
             .at[:h, :num_classes].set(params["w_out"])).astype(jnp.bfloat16)
    b_out = jnp.zeros((1, c_pad), jnp.float32).at[:, :num_classes].set(
        params["b_out"])
    mask = jnp.zeros((1, h_pad), jnp.float32).at[:, :h].set(
        dropout_mask.reshape(1, h))

    # ---- features: (chain, step, din) -> group-major, step-major, chain-in-group ----
    feat3 = features.reshape(n_chains, n_steps, din)
    feat3 = jnp.pad(feat3, ((0, chains_pad - n_chains), (0, 0), (0, 0)))
    feat_flat = (feat3.reshape(n_groups, _CHAINS, n_steps, din)
                 .transpose(0, 2, 1, 3)
                 .reshape(n_groups * rows_per_group, din))

    kernel = _make_decoder_kernel(num_classes, h_pad, c_pad, n_steps)

    grid_spec = pltpu.PrefetchScalarGridSpec(
        num_scalar_prefetch=0,
        grid=(n_groups,),
        in_specs=[
            pl.BlockSpec((rows_per_group, din), lambda g: (g, 0)),   # features
            pl.BlockSpec((din, g_pad), lambda g: (0, 0)),            # W_ih (feature part)
            pl.BlockSpec((1, g_pad), lambda g: (0, 0)),              # gate bias
            pl.BlockSpec((c_pad, g_pad), lambda g: (0, 0)),          # embed @ W_ih_e
            pl.BlockSpec((h_pad, g_pad), lambda g: (0, 0)),          # W_hh
            pl.BlockSpec((h_pad, c_pad), lambda g: (0, 0)),          # out weight
            pl.BlockSpec((1, c_pad), lambda g: (0, 0)),              # out bias
            pl.BlockSpec((1, h_pad), lambda g: (0, 0)),              # dropout mask
        ],
        out_specs=pl.BlockSpec((rows_per_group, c_pad), lambda g: (g, 0)),
        scratch_shapes=[
            pltpu.VMEM((rows_per_group, g_pad), jnp.float32),        # hoisted x-proj
        ],
    )

    dists_pad = pl.pallas_call(
        kernel,
        out_shape=jax.ShapeDtypeStruct((n_groups * rows_per_group, c_pad),
                                       jnp.float32),
        grid_spec=grid_spec,
        compiler_params=pltpu.CompilerParams(
            dimension_semantics=("parallel",)),      # chain groups shard across TCs (v7x)
    )(feat_flat, w_ih_f, b, embw, w_hh, w_out, b_out, mask)

    # (G*L*8, C_pad) -> (chain, step, class), real chains / real classes only.
    d = (dists_pad.reshape(n_groups, n_steps, _CHAINS, c_pad)
         .transpose(0, 2, 1, 3)
         .reshape(chains_pad, n_steps, c_pad)[:n_chains, :, :num_classes])

    # drop the per-image dummy-root node (processing-order last of each chain)
    out_dists = d[:, :n_steps - 1, :].reshape(n - batch_size, num_classes)

    # commitments: first argmax over non-background classes, recomputed from dists.
    # NOTE: matches the in-kernel packed-key argmax that feeds the next-step
    # embedding (same first-max / background-excluded rule) up to near-exact ties.
    commits = (jnp.argmax(d[:, :n_steps - 1, 1:], axis=-1) + 1).astype(jnp.int32)
    out_commitments = jnp.concatenate(
        [commits.reshape(-1), jnp.zeros((batch_size,), dtype=jnp.int32)], axis=0)
    return out_dists, out_commitments


def _get_dropout_mask(key, p, dim):
    keep = (jax.random.uniform(key, (dim,)) > p).astype(jnp.float32)
    return keep / (1.0 - p)


def _init_params(key, num_classes, embed_dim, inputs_dim, hidden_dim):
    ks = jax.random.split(key, 8)
    c, e, din, h = num_classes, embed_dim, inputs_dim, hidden_dim
    embed_w = 0.1 * jax.random.normal(ks[0], (c, e), jnp.float32)   # obj_edge_vectors stand-in
    s_in = 1.0 / math.sqrt(din + e + h)
    return {
        "embed_w": embed_w,
        "w_ih_f": s_in * jax.random.normal(ks[1], (din, 4 * h), jnp.float32),
        "w_ih_e": s_in * jax.random.normal(ks[2], (e, 4 * h), jnp.float32),
        "w_hh": s_in * jax.random.normal(ks[3], (h, 4 * h), jnp.float32),
        "b": jnp.zeros((1, 4 * h), jnp.float32),
        # xavier_normal for the out layer, zero bias (as in __init__)
        "w_out": math.sqrt(2.0 / (h + c))
                 * jax.random.normal(ks[4], (h, c), jnp.float32),
        "b_out": jnp.zeros((1, c), jnp.float32),
    }


if __name__ == "__main__":
    num_obj = 10          # total nodes in the forest (incl. one dummy root / image)
    batch_size = 2
    inputs_dim = 64
    embed_dim = 32
    hidden_dim = 64       # tree half + chain half
    num_classes = 32
    dropout = 0.2

    key = jax.random.PRNGKey(0)
    k_param, k_feat, k_tree, k_chain = jax.random.split(key, 4)

    params = _init_params(k_param, num_classes, embed_dim, inputs_dim, hidden_dim)
    features = jax.random.normal(k_feat, (num_obj, inputs_dim), jnp.float32)

    # stand-ins for get_dropout_mask(dropout, hidden/2) x2 (pass ones for eval)
    tree_mask = _get_dropout_mask(k_tree, dropout, hidden_dim // 2)
    chain_mask = _get_dropout_mask(k_chain, dropout, hidden_dim // 2)
    dropout_mask = jnp.concatenate([tree_mask, chain_mask])

    out_dists, out_commitments = decoder_hrtree_lstm_forward(
        features, params, dropout_mask, batch_size)

    jax.block_until_ready((out_dists, out_commitments))
    assert out_dists.shape == (num_obj - batch_size, num_classes)
    assert out_commitments.shape == (num_obj,)
    print("KERNEL_OK")
</pallas_src>

<mosaic_0001>
module attributes {stable_mosaic.version = 11 : i64} {
  func.func @kernel(%arg0: i32, %arg1: memref<40x64xf32, #tpu.memory_space<vmem>>, %arg2: memref<64x512xbf16, #tpu.memory_space<vmem>>, %arg3: memref<1x512xf32, #tpu.memory_space<vmem>>, %arg4: memref<128x512xbf16, #tpu.memory_space<vmem>>, %arg5: memref<128x512xbf16, #tpu.memory_space<vmem>>, %arg6: memref<128x128xbf16, #tpu.memory_space<vmem>>, %arg7: memref<1x128xf32, #tpu.memory_space<vmem>>, %arg8: memref<1x128xf32, #tpu.memory_space<vmem>>, %arg9: memref<40x128xf32, #tpu.memory_space<vmem>>, %arg10: memref<40x512xf32, #tpu.memory_space<vmem>>) attributes {dimension_semantics = [#tpu.dimension_semantics<parallel>], iteration_bounds = array<i64: 1>, scalar_prefetch = 0 : i64, scratch_operands = 1 : i64, tpu.core_type = #tpu.core_type<tc>, window_params = [{transform_indices = @transform_0, window_bounds = array<i64: 40, 64>}, {pipeline_mode = #tpu.pipeline_mode<synchronous>, transform_indices = @transform_1, window_bounds = array<i64: 64, 512>}, {pipeline_mode = #tpu.pipeline_mode<synchronous>, transform_indices = @transform_2, window_bounds = array<i64: 1, 512>}, {pipeline_mode = #tpu.pipeline_mode<synchronous>, transform_indices = @transform_3, window_bounds = array<i64: 128, 512>}, {pipeline_mode = #tpu.pipeline_mode<synchronous>, transform_indices = @transform_4, window_bounds = array<i64: 128, 512>}, {pipeline_mode = #tpu.pipeline_mode<synchronous>, transform_indices = @transform_5, window_bounds = array<i64: 128, 128>}, {pipeline_mode = #tpu.pipeline_mode<synchronous>, transform_indices = @transform_6, window_bounds = array<i64: 1, 128>}, {pipeline_mode = #tpu.pipeline_mode<synchronous>, transform_indices = @transform_7, window_bounds = array<i64: 1, 128>}, {transform_indices = @transform_8, window_bounds = array<i64: 40, 128>}]} {
    %c0 = arith.constant 0 : index
    %c0_0 = arith.constant 0 : index
    %0 = vector.load %arg1[%c0, %c0_0] : memref<40x64xf32, #tpu.memory_space<vmem>>, vector<40x64xf32>
    %1 = arith.truncf %0 : vector<40x64xf32> to vector<40x64xbf16>
    %c0_1 = arith.constant 0 : index
    %c0_2 = arith.constant 0 : index
    %2 = vector.load %arg2[%c0_1, %c0_2] : memref<64x512xbf16, #tpu.memory_space<vmem>>, vector<64x512xbf16>
    %cst = arith.constant dense<0.000000e+00> : vector<40x512xf32>
    %3 = tpu.matmul %1, %2, %cst {dimension_numbers = #tpu.dot_dimension_numbers<[1], [0], [0], [1], [0, 0, 1, 1], [], []>} : vector<40x64xbf16>, vector<64x512xbf16>, vector<40x512xf32> -> vector<40x512xf32>
    %c0_3 = arith.constant 0 : index
    %c0_4 = arith.constant 0 : index
    %4 = vector.load %arg3[%c0_3, %c0_4] : memref<1x512xf32, #tpu.memory_space<vmem>>, vector<1x512xf32>
    %5 = vector.broadcast %4 : vector<1x512xf32> to vector<40x512xf32>
    %6 = arith.addf %3, %5 : vector<40x512xf32>
    %c0_5 = arith.constant 0 : index
    %c0_6 = arith.constant 0 : index
    %7 = vector.load %arg10[%c0_5, %c0_6] : memref<40x512xf32, #tpu.memory_space<vmem>>, vector<40x512xf32>
    tpu.vector_store %arg10[%c0_5, %c0_6], %6 {strides = array<i32>} : memref<40x512xf32, #tpu.memory_space<vmem>>, vector<40x512xf32>,
    %c0_7 = arith.constant 0 : index
    %c0_8 = arith.constant 0 : index
    %8 = vector.load %arg8[%c0_7, %c0_8] : memref<1x128xf32, #tpu.memory_space<vmem>>, vector<1x128xf32>
    %9 = vector.shape_cast %8 : vector<1x128xf32> to vector<1x128xf32>
    %10 = vector.broadcast %9 : vector<1x128xf32> to vector<8x128xf32>
    %c0_9 = arith.constant 0 : index
    %c0_10 = arith.constant 0 : index
    %11 = vector.load %arg7[%c0_9, %c0_10] : memref<1x128xf32, #tpu.memory_space<vmem>>, vector<1x128xf32>
    %12 = vector.shape_cast %11 : vector<1x128xf32> to vector<1x128xf32>
    %13 = vector.broadcast %12 : vector<1x128xf32> to vector<8x128xf32>
    %14 = tpu.iota {dimensions = array<i32: 1>} : vector<8x128xi32>
    %c0_i32 = arith.constant 0 : i32
    %15 = vector.broadcast %c0_i32 : i32 to vector<8x128xi32>
    %16 = arith.cmpi eq, %14, %15 : vector<8x128xi32>
    %c32_i32 = arith.constant 32 : i32
    %17 = vector.broadcast %c32_i32 : i32 to vector<8x128xi32>
    %18 = arith.cmpi sge, %14, %17 : vector<8x128xi32>
    %19 = arith.ori %16, %18 : vector<8x128xi1>
    %c127_i32 = arith.constant 127 : i32
    %20 = vector.broadcast %c127_i32 : i32 to vector<8x128xi32>
    %21 = arith.subi %20, %14 : vector<8x128xi32>
    %cst_11 = arith.constant 0.000000e+00 : f32
    %22 = vector.broadcast %cst_11 : f32 to vector<8x128xf32>
    %cst_12 = arith.constant 0.000000e+00 : f32
    %23 = vector.broadcast %cst_12 : f32 to vector<8x128xf32>
    %c0_i32_13 = arith.constant 0 : i32
    %24 = vector.broadcast %c0_i32_13 : i32 to vector<8x128xi32>
    %25 = arith.cmpi eq, %14, %24 : vector<8x128xi32>
    %26 = arith.extui %25 : vector<8x128xi1> to vector<8x128xi32>
    %27 = arith.sitofp %26 : vector<8x128xi32> to vector<8x128xf32>
    %28 = arith.truncf %27 : vector<8x128xf32> to vector<8x128xbf16>
    %c0_i32_14 = arith.constant 0 : i32
    %c8_i32 = arith.constant 8 : i32
    %29 = arith.muli %c0_i32_14, %c8_i32 : i32
    %30 = tpu.assume_multiple %29, 8 : i32
    %31 = arith.index_cast %30 : i32 to index
    %c0_15 = arith.constant 0 : index
    %32 = vector.load %arg10[%31, %c0_15] : memref<40x512xf32, #tpu.memory_space<vmem>>, vector<8x512xf32>
    %c0_16 = arith.constant 0 : index
    %c0_17 = arith.constant 0 : index
    %33 = vector.load %arg4[%c0_16, %c0_17] : memref<128x512xbf16, #tpu.memory_space<vmem>>, vector<128x512xbf16>
    %cst_18 = arith.constant dense<0.000000e+00> : vector<8x512xf32>
    %34 = tpu.matmul %28, %33, %cst_18 {dimension_numbers = #tpu.dot_dimension_numbers<[1], [0], [0], [1], [0, 0, 1, 1], [], []>} : vector<8x128xbf16>, vector<128x512xbf16>, vector<8x512xf32> -> vector<8x512xf32>
    %35 = arith.truncf %22 : vector<8x128xf32> to vector<8x128xbf16>
    %c0_19 = arith.constant 0 : index
    %c0_20 = arith.constant 0 : index
    %36 = vector.load %arg5[%c0_19, %c0_20] : memref<128x512xbf16, #tpu.memory_space<vmem>>, vector<128x512xbf16>
    %cst_21 = arith.constant dense<0.000000e+00> : vector<8x512xf32>
    %37 = tpu.matmul %35, %36, %cst_21 {dimension_numbers = #tpu.dot_dimension_numbers<[1], [0], [0], [1], [0, 0, 1, 1], [], []>} : vector<8x128xbf16>, vector<128x512xbf16>, vector<8x512xf32> -> vector<8x512xf32>
    %38 = arith.addf %34, %37 : vector<8x512xf32>
    %39 = arith.addf %38, %32 : vector<8x512xf32>
    %40 = vector.extract_strided_slice %39 {offsets = [0, 0], sizes = [8, 128], strides = [1, 1]} : vector<8x512xf32> to vector<8x128xf32>
    %41 = arith.negf %40 : vector<8x128xf32>
    %42 = math.exp %41 : vector<8x128xf32>
    %cst_22 = arith.constant 1.000000e+00 : f32
    %43 = vector.broadcast %cst_22 : f32 to vector<8x128xf32>
    %44 = arith.addf %43, %42 : vector<8x128xf32>
    %45 = arith.divf %43, %44 : vector<8x128xf32>
    %46 = vector.extract_strided_slice %39 {offsets = [0, 128], sizes = [8, 128], strides = [1, 1]} : vector<8x512xf32> to vector<8x128xf32>
    %47 = arith.negf %46 : vector<8x128xf32>
    %48 = math.exp %47 : vector<8x128xf32>
    %cst_23 = arith.constant 1.000000e+00 : f32
    %49 = vector.broadcast %cst_23 : f32 to vector<8x128xf32>
    %50 = arith.addf %49, %48 : vector<8x128xf32>
    %51 = arith.divf %49, %50 : vector<8x128xf32>
    %52 = vector.extract_strided_slice %39 {offsets = [0, 256], sizes = [8, 128], strides = [1, 1]} : vector<8x512xf32> to vector<8x128xf32>
    %53 = math.tanh %52 : vector<8x128xf32>
    %54 = vector.extract_strided_slice %39 {offsets = [0, 384], sizes = [8, 128], strides = [1, 1]} : vector<8x512xf32> to vector<8x128xf32>
    %55 = arith.negf %54 : vector<8x128xf32>
    %56 = math.exp %55 : vector<8x128xf32>
    %cst_24 = arith.constant 1.000000e+00 : f32
    %57 = vector.broadcast %cst_24 : f32 to vector<8x128xf32>
    %58 = arith.addf %57, %56 : vector<8x128xf32>
    %59 = arith.divf %57, %58 : vector<8x128xf32>
    %60 = arith.mulf %51, %23 : vector<8x128xf32>
    %61 = arith.mulf %45, %53 : vector<8x128xf32>
    %62 = arith.addf %60, %61 : vector<8x128xf32>
    %63 = math.tanh %62 : vector<8x128xf32>
    %64 = arith.mulf %59, %63 : vector<8x128xf32>
    %65 = arith.mulf %64, %10 : vector<8x128xf32>
    %66 = arith.truncf %65 : vector<8x128xf32> to vector<8x128xbf16>
    %c0_25 = arith.constant 0 : index
    %c0_26 = arith.constant 0 : index
    %67 = vector.load %arg6[%c0_25, %c0_26] : memref<128x128xbf16, #tpu.memory_space<vmem>>, vector<128x128xbf16>
    %cst_27 = arith.constant dense<0.000000e+00> : vector<8x128xf32>
    %68 = tpu.matmul %66, %67, %cst_27 {dimension_numbers = #tpu.dot_dimension_numbers<[1], [0], [0], [1], [0, 0, 1, 1], [], []>} : vector<8x128xbf16>, vector<128x128xbf16>, vector<8x128xf32> -> vector<8x128xf32>
    %69 = arith.addf %68, %13 : vector<8x128xf32>
    %70 = arith.index_cast %30 : i32 to index
    %c0_28 = arith.constant 0 : index
    %71 = vector.load %arg9[%70, %c0_28] : memref<40x128xf32, #tpu.memory_space<vmem>>, vector<8x128xf32>
    tpu.vector_store %arg9[%70, %c0_28], %69 {strides = array<i32>} : memref<40x128xf32, #tpu.memory_space<vmem>>, vector<8x128xf32>,
    %72 = tpu.bitcast %69 : vector<8x128xf32> -> vector<8x128xi32>
    %c0_i32_29 = arith.constant 0 : i32
    %73 = vector.broadcast %c0_i32_29 : i32 to vector<8x128xi32>
    %74 = arith.cmpi slt, %72, %73 : vector<8x128xi32>
    %c2147483647_i32 = arith.constant 2147483647 : i32
    %75 = vector.broadcast %c2147483647_i32 : i32 to vector<8x128xi32>
    %76 = arith.xori %72, %75 : vector<8x128xi32>
    %77 = arith.select %74, %76, %72 : vector<8x128xi1>, vector<8x128xi32>
    %c-128_i32 = arith.constant -128 : i32
    %78 = vector.broadcast %c-128_i32 : i32 to vector<8x128xi32>
    %79 = arith.andi %77, %78 : vector<8x128xi32>
    %80 = arith.ori %79, %21 : vector<8x128xi32>
    %c-2147483648_i32 = arith.constant -2147483648 : i32
    %81 = vector.broadcast %c-2147483648_i32 : i32 to vector<8x128xi32>
    %82 = arith.select %19, %81, %80 : vector<8x128xi1>, vector<8x128xi32>
    %cst_30 = arith.constant dense<-2147483648> : vector<8xi32>
    %83 = vector.multi_reduction <maxsi>, %82, %cst_30 [1] : vector<8x128xi32> to vector<8xi32>
    %84 = vector.shape_cast %83 : vector<8xi32> to vector<8x1xi32>
    %85 = vector.broadcast %84 : vector<8x1xi32> to vector<8x128xi32>
    %86 = arith.cmpi eq, %82, %85 : vector<8x128xi32>
    %87 = arith.extui %86 : vector<8x128xi1> to vector<8x128xi32>
    %88 = arith.sitofp %87 : vector<8x128xi32> to vector<8x128xf32>
    %89 = arith.truncf %88 : vector<8x128xf32> to vector<8x128xbf16>
    %c1_i32 = arith.constant 1 : i32
    %c8_i32_31 = arith.constant 8 : i32
    %90 = arith.muli %c1_i32, %c8_i32_31 : i32
    %91 = tpu.assume_multiple %90, 8 : i32
    %92 = arith.index_cast %91 : i32 to index
    %c0_32 = arith.constant 0 : index
    %93 = vector.load %arg10[%92, %c0_32] : memref<40x512xf32, #tpu.memory_space<vmem>>, vector<8x512xf32>
    %c0_33 = arith.constant 0 : index
    %c0_34 = arith.constant 0 : index
    %94 = vector.load %arg4[%c0_33, %c0_34] : memref<128x512xbf16, #tpu.memory_space<vmem>>, vector<128x512xbf16>
    %cst_35 = arith.constant dense<0.000000e+00> : vector<8x512xf32>
    %95 = tpu.matmul %89, %94, %cst_35 {dimension_numbers = #tpu.dot_dimension_numbers<[1], [0], [0], [1], [0, 0, 1, 1], [], []>} : vector<8x128xbf16>, vector<128x512xbf16>, vector<8x512xf32> -> vector<8x512xf32>
    %96 = arith.truncf %65 : vector<8x128xf32> to vector<8x128xbf16>
    %c0_36 = arith.constant 0 : index
    %c0_37 = arith.constant 0 : index
    %97 = vector.load %arg5[%c0_36, %c0_37] : memref<128x512xbf16, #tpu.memory_space<vmem>>, vector<128x512xbf16>
    %cst_38 = arith.constant dense<0.000000e+00> : vector<8x512xf32>
    %98 = tpu.matmul %96, %97, %cst_38 {dimension_numbers = #tpu.dot_dimension_numbers<[1], [0], [0], [1], [0, 0, 1, 1], [], []>} : vector<8x128xbf16>, vector<128x512xbf16>, vector<8x512xf32> -> vector<8x512xf32>
    %99 = arith.addf %95, %98 : vector<8x512xf32>
    %100 = arith.addf %99, %93 : vector<8x512xf32>
    %101 = vector.extract_strided_slice %100 {offsets = [0, 0], sizes = [8, 128], strides = [1, 1]} : vector<8x512xf32> to vector<8x128xf32>
    %102 = arith.negf %101 : vector<8x128xf32>
    %103 = math.exp %102 : vector<8x128xf32>
    %cst_39 = arith.constant 1.000000e+00 : f32
    %104 = vector.broadcast %cst_39 : f32 to vector<8x128xf32>
    %105 = arith.addf %104, %103 : vector<8x128xf32>
    %106 = arith.divf %104, %105 : vector<8x128xf32>
    %107 = vector.extract_strided_slice %100 {offsets = [0, 128], sizes = [8, 128], strides = [1, 1]} : vector<8x512xf32> to vector<8x128xf32>
    %108 = arith.negf %107 : vector<8x128xf32>
    %109 = math.exp %108 : vector<8x128xf32>
    %cst_40 = arith.constant 1.000000e+00 : f32
    %110 = vector.broadcast %cst_40 : f32 to vector<8x128xf32>
    %111 = arith.addf %110, %109 : vector<8x128xf32>
    %112 = arith.divf %110, %111 : vector<8x128xf32>
    %113 = vector.extract_strided_slice %100 {offsets = [0, 256], sizes = [8, 128], strides = [1, 1]} : vector<8x512xf32> to vector<8x128xf32>
    %114 = math.tanh %113 : vector<8x128xf32>
    %115 = vector.extract_strided_slice %100 {offsets = [0, 384], sizes = [8, 128], strides = [1, 1]} : vector<8x512xf32> to vector<8x128xf32>
    %116 = arith.negf %115 : vector<8x128xf32>
    %117 = math.exp %116 : vector<8x128xf32>
    %cst_41 = arith.constant 1.000000e+00 : f32
    %118 = vector.broadcast %cst_41 : f32 to vector<8x128xf32>
    %119 = arith.addf %118, %117 : vector<8x128xf32>
    %120 = arith.divf %118, %119 : vector<8x128xf32>
    %121 = arith.mulf %112, %62 : vector<8x128xf32>
    %122 = arith.mulf %106, %114 : vector<8x128xf32>
    %123 = arith.addf %121, %122 : vector<8x128xf32>
    %124 = math.tanh %123 : vector<8x128xf32>
    %125 = arith.mulf %120, %124 : vector<8x128xf32>
    %126 = arith.mulf %125, %10 : vector<8x128xf32>
    %127 = arith.truncf %126 : vector<8x128xf32> to vector<8x128xbf16>
    %c0_42 = arith.constant 0 : index
    %c0_43 = arith.constant 0 : index
    %128 = vector.load %arg6[%c0_42, %c0_43] : memref<128x128xbf16, #tpu.memory_space<vmem>>, vector<128x128xbf16>
    %cst_44 = arith.constant dense<0.000000e+00> : vector<8x128xf32>
    %129 = tpu.matmul %127, %128, %cst_44 {dimension_numbers = #tpu.dot_dimension_numbers<[1], [0], [0], [1], [0, 0, 1, 1], [], []>} : vector<8x128xbf16>, vector<128x128xbf16>, vector<8x128xf32> -> vector<8x128xf32>
    %130 = arith.addf %129, %13 : vector<8x128xf32>
    %131 = arith.index_cast %91 : i32 to index
    %c0_45 = arith.constant 0 : index
    %132 = vector.load %arg9[%131, %c0_45] : memref<40x128xf32, #tpu.memory_space<vmem>>, vector<8x128xf32>
    tpu.vector_store %arg9[%131, %c0_45], %130 {strides = array<i32>} : memref<40x128xf32, #tpu.memory_space<vmem>>, vector<8x128xf32>,
    %133 = tpu.bitcast %130 : vector<8x128xf32> -> vector<8x128xi32>
    %c0_i32_46 = arith.constant 0 : i32
    %134 = vector.broadcast %c0_i32_46 : i32 to vector<8x128xi32>
    %135 = arith.cmpi slt, %133, %134 : vector<8x128xi32>
    %c2147483647_i32_47 = arith.constant 2147483647 : i32
    %136 = vector.broadcast %c2147483647_i32_47 : i32 to vector<8x128xi32>
    %137 = arith.xori %133, %136 : vector<8x128xi32>
    %138 = arith.select %135, %137, %133 : vector<8x128xi1>, vector<8x128xi32>
    %c-128_i32_48 = arith.constant -128 : i32
    %139 = vector.broadcast %c-128_i32_48 : i32 to vector<8x128xi32>
    %140 = arith.andi %138, %139 : vector<8x128xi32>
    %141 = arith.ori %140, %21 : vector<8x128xi32>
    %c-2147483648_i32_49 = arith.constant -2147483648 : i32
    %142 = vector.broadcast %c-2147483648_i32_49 : i32 to vector<8x128xi32>
    %143 = arith.select %19, %142, %141 : vector<8x128xi1>, vector<8x128xi32>
    %cst_50 = arith.constant dense<-2147483648> : vector<8xi32>
    %144 = vector.multi_reduction <maxsi>, %143, %cst_50 [1] : vector<8x128xi32> to vector<8xi32>
    %145 = vector.shape_cast %144 : vector<8xi32> to vector<8x1xi32>
    %146 = vector.broadcast %145 : vector<8x1xi32> to vector<8x128xi32>
    %147 = arith.cmpi eq, %143, %146 : vector<8x128xi32>
    %148 = arith.extui %147 : vector<8x128xi1> to vector<8x128xi32>
    %149 = arith.sitofp %148 : vector<8x128xi32> to vector<8x128xf32>
    %150 = arith.truncf %149 : vector<8x128xf32> to vector<8x128xbf16>
    %c2_i32 = arith.constant 2 : i32
    %c8_i32_51 = arith.constant 8 : i32
    %151 = arith.muli %c2_i32, %c8_i32_51 : i32
    %152 = tpu.assume_multiple %151, 8 : i32
    %153 = arith.index_cast %152 : i32 to index
    %c0_52 = arith.constant 0 : index
    %154 = vector.load %arg10[%153, %c0_52] : memref<40x512xf32, #tpu.memory_space<vmem>>, vector<8x512xf32>
    %c0_53 = arith.constant 0 : index
    %c0_54 = arith.constant 0 : index
    %155 = vector.load %arg4[%c0_53, %c0_54] : memref<128x512xbf16, #tpu.memory_space<vmem>>, vector<128x512xbf16>
    %cst_55 = arith.constant dense<0.000000e+00> : vector<8x512xf32>
    %156 = tpu.matmul %150, %155, %cst_55 {dimension_numbers = #tpu.dot_dimension_numbers<[1], [0], [0], [1], [0, 0, 1, 1], [], []>} : vector<8x128xbf16>, vector<128x512xbf16>, vector<8x512xf32> -> vector<8x512xf32>
    %157 = arith.truncf %126 : vector<8x128xf32> to vector<8x128xbf16>
    %c0_56 = arith.constant 0 : index
    %c0_57 = arith.constant 0 : index
    %158 = vector.load %arg5[%c0_56, %c0_57] : memref<128x512xbf16, #tpu.memory_space<vmem>>, vector<128x512xbf16>
    %cst_58 = arith.constant dense<0.000000e+00> : vector<8x512xf32>
    %159 = tpu.matmul %157, %158, %cst_58 {dimension_numbers = #tpu.dot_dimension_numbers<[1], [0], [0], [1], [0, 0, 1, 1], [], []>} : vector<8x128xbf16>, vector<128x512xbf16>, vector<8x512xf32> -> vector<8x512xf32>
    %160 = arith.addf %156, %159 : vector<8x512xf32>
    %161 = arith.addf %160, %154 : vector<8x512xf32>
    %162 = vector.extract_strided_slice %161 {offsets = [0, 0], sizes = [8, 128], strides = [1, 1]} : vector<8x512xf32> to vector<8x128xf32>
    %163 = arith.negf %162 : vector<8x128xf32>
    %164 = math.exp %163 : vector<8x128xf32>
    %cst_59 = arith.constant 1.000000e+00 : f32
    %165 = vector.broadcast %cst_59 : f32 to vector<8x128xf32>
    %166 = arith.addf %165, %164 : vector<8x128xf32>
    %167 = arith.divf %165, %166 : vector<8x128xf32>
    %168 = vector.extract_strided_slice %161 {offsets = [0, 128], sizes = [8, 128], strides = [1, 1]} : vector<8x512xf32> to vector<8x128xf32>
    %169 = arith.negf %168 : vector<8x128xf32>
    %170 = math.exp %169 : vector<8x128xf32>
    %cst_60 = arith.constant 1.000000e+00 : f32
    %171 = vector.broadcast %cst_60 : f32 to vector<8x128xf32>
    %172 = arith.addf %171, %170 : vector<8x128xf32>
    %173 = arith.divf %171, %172 : vector<8x128xf32>
    %174 = vector.extract_strided_slice %161 {offsets = [0, 256], sizes = [8, 128], strides = [1, 1]} : vector<8x512xf32> to vector<8x128xf32>
    %175 = math.tanh %174 : vector<8x128xf32>
    %176 = vector.extract_strided_slice %161 {offsets = [0, 384], sizes = [8, 128], strides = [1, 1]} : vector<8x512xf32> to vector<8x128xf32>
    %177 = arith.negf %176 : vector<8x128xf32>
    %178 = math.exp %177 : vector<8x128xf32>
    %cst_61 = arith.constant 1.000000e+00 : f32
    %179 = vector.broadcast %cst_61 : f32 to vector<8x128xf32>
    %180 = arith.addf %179, %178 : vector<8x128xf32>
    %181 = arith.divf %179, %180 : vector<8x128xf32>
    %182 = arith.mulf %173, %123 : vector<8x128xf32>
    %183 = arith.mulf %167, %175 : vector<8x128xf32>
    %184 = arith.addf %182, %183 : vector<8x128xf32>
    %185 = math.tanh %184 : vector<8x128xf32>
    %186 = arith.mulf %181, %185 : vector<8x128xf32>
    %187 = arith.mulf %186, %10 : vector<8x128xf32>
    %188 = arith.truncf %187 : vector<8x128xf32> to vector<8x128xbf16>
    %c0_62 = arith.constant 0 : index
    %c0_63 = arith.constant 0 : index
    %189 = vector.load %arg6[%c0_62, %c0_63] : memref<128x128xbf16, #tpu.memory_space<vmem>>, vector<128x128xbf16>
    %cst_64 = arith.constant dense<0.000000e+00> : vector<8x128xf32>
    %190 = tpu.matmul %188, %189, %cst_64 {dimension_numbers = #tpu.dot_dimension_numbers<[1], [0], [0], [1], [0, 0, 1, 1], [], []>} : vector<8x128xbf16>, vector<128x128xbf16>, vector<8x128xf32> -> vector<8x128xf32>
    %191 = arith.addf %190, %13 : vector<8x128xf32>
    %192 = arith.index_cast %152 : i32 to index
    %c0_65 = arith.constant 0 : index
    %193 = vector.load %arg9[%192, %c0_65] : memref<40x128xf32, #tpu.memory_space<vmem>>, vector<8x128xf32>
    tpu.vector_store %arg9[%192, %c0_65], %191 {strides = array<i32>} : memref<40x128xf32, #tpu.memory_space<vmem>>, vector<8x128xf32>,
    %194 = tpu.bitcast %191 : vector<8x128xf32> -> vector<8x128xi32>
    %c0_i32_66 = arith.constant 0 : i32
    %195 = vector.broadcast %c0_i32_66 : i32 to vector<8x128xi32>
    %196 = arith.cmpi slt, %194, %195 : vector<8x128xi32>
    %c2147483647_i32_67 = arith.constant 2147483647 : i32
    %197 = vector.broadcast %c2147483647_i32_67 : i32 to vector<8x128xi32>
    %198 = arith.xori %194, %197 : vector<8x128xi32>
    %199 = arith.select %196, %198, %194 : vector<8x128xi1>, vector<8x128xi32>
    %c-128_i32_68 = arith.constant -128 : i32
    %200 = vector.broadcast %c-128_i32_68 : i32 to vector<8x128xi32>
    %201 = arith.andi %199, %200 : vector<8x128xi32>
    %202 = arith.ori %201, %21 : vector<8x128xi32>
    %c-2147483648_i32_69 = arith.constant -2147483648 : i32
    %203 = vector.broadcast %c-2147483648_i32_69 : i32 to vector<8x128xi32>
    %204 = arith.select %19, %203, %202 : vector<8x128xi1>, vector<8x128xi32>
    %cst_70 = arith.constant dense<-2147483648> : vector<8xi32>
    %205 = vector.multi_reduction <maxsi>, %204, %cst_70 [1] : vector<8x128xi32> to vector<8xi32>
    %206 = vector.shape_cast %205 : vector<8xi32> to vector<8x1xi32>
    %207 = vector.broadcast %206 : vector<8x1xi32> to vector<8x128xi32>
    %208 = arith.cmpi eq, %204, %207 : vector<8x128xi32>
    %209 = arith.extui %208 : vector<8x128xi1> to vector<8x128xi32>
    %210 = arith.sitofp %209 : vector<8x128xi32> to vector<8x128xf32>
    %211 = arith.truncf %210 : vector<8x128xf32> to vector<8x128xbf16>
    %c3_i32 = arith.constant 3 : i32
    %c8_i32_71 = arith.constant 8 : i32
    %212 = arith.muli %c3_i32, %c8_i32_71 : i32
    %213 = tpu.assume_multiple %212, 8 : i32
    %214 = arith.index_cast %213 : i32 to index
    %c0_72 = arith.constant 0 : index
    %215 = vector.load %arg10[%214, %c0_72] : memref<40x512xf32, #tpu.memory_space<vmem>>, vector<8x512xf32>
    %c0_73 = arith.constant 0 : index
    %c0_74 = arith.constant 0 : index
    %216 = vector.load %arg4[%c0_73, %c0_74] : memref<128x512xbf16, #tpu.memory_space<vmem>>, vector<128x512xbf16>
    %cst_75 = arith.constant dense<0.000000e+00> : vector<8x512xf32>
    %217 = tpu.matmul %211, %216, %cst_75 {dimension_numbers = #tpu.dot_dimension_numbers<[1], [0], [0], [1], [0, 0, 1, 1], [], []>} : vector<8x128xbf16>, vector<128x512xbf16>, vector<8x512xf32> -> vector<8x512xf32>
    %218 = arith.truncf %187 : vector<8x128xf32> to vector<8x128xbf16>
    %c0_76 = arith.constant 0 : index
    %c0_77 = arith.constant 0 : index
    %219 = vector.load %arg5[%c0_76, %c0_77] : memref<128x512xbf16, #tpu.memory_space<vmem>>, vector<128x512xbf16>
    %cst_78 = arith.constant dense<0.000000e+00> : vector<8x512xf32>
    %220 = tpu.matmul %218, %219, %cst_78 {dimension_numbers = #tpu.dot_dimension_numbers<[1], [0], [0], [1], [0, 0, 1, 1], [], []>} : vector<8x128xbf16>, vector<128x512xbf16>, vector<8x512xf32> -> vector<8x512xf32>
    %221 = arith.addf %217, %220 : vector<8x512xf32>
    %222 = arith.addf %221, %215 : vector<8x512xf32>
    %223 = vector.extract_strided_slice %222 {offsets = [0, 0], sizes = [8, 128], strides = [1, 1]} : vector<8x512xf32> to vector<8x128xf32>
    %224 = arith.negf %223 : vector<8x128xf32>
    %225 = math.exp %224 : vector<8x128xf32>
    %cst_79 = arith.constant 1.000000e+00 : f32
    %226 = vector.broadcast %cst_79 : f32 to vector<8x128xf32>
    %227 = arith.addf %226, %225 : vector<8x128xf32>
    %228 = arith.divf %226, %227 : vector<8x128xf32>
    %229 = vector.extract_strided_slice %222 {offsets = [0, 128], sizes = [8, 128], strides = [1, 1]} : vector<8x512xf32> to vector<8x128xf32>
    %230 = arith.negf %229 : vector<8x128xf32>
    %231 = math.exp %230 : vector<8x128xf32>
    %cst_80 = arith.constant 1.000000e+00 : f32
    %232 = vector.broadcast %cst_80 : f32 to vector<8x128xf32>
    %233 = arith.addf %232, %231 : vector<8x128xf32>
    %234 = arith.divf %232, %233 : vector<8x128xf32>
    %235 = vector.extract_strided_slice %222 {offsets = [0, 256], sizes = [8, 128], strides = [1, 1]} : vector<8x512xf32> to vector<8x128xf32>
    %236 = math.tanh %235 : vector<8x128xf32>
    %237 = vector.extract_strided_slice %222 {offsets = [0, 384], sizes = [8, 128], strides = [1, 1]} : vector<8x512xf32> to vector<8x128xf32>
    %238 = arith.negf %237 : vector<8x128xf32>
    %239 = math.exp %238 : vector<8x128xf32>
    %cst_81 = arith.constant 1.000000e+00 : f32
    %240 = vector.broadcast %cst_81 : f32 to vector<8x128xf32>
    %241 = arith.addf %240, %239 : vector<8x128xf32>
    %242 = arith.divf %240, %241 : vector<8x128xf32>
    %243 = arith.mulf %234, %184 : vector<8x128xf32>
    %244 = arith.mulf %228, %236 : vector<8x128xf32>
    %245 = arith.addf %243, %244 : vector<8x128xf32>
    %246 = math.tanh %245 : vector<8x128xf32>
    %247 = arith.mulf %242, %246 : vector<8x128xf32>
    %248 = arith.mulf %247, %10 : vector<8x128xf32>
    %249 = arith.truncf %248 : vector<8x128xf32> to vector<8x128xbf16>
    %c0_82 = arith.constant 0 : index
    %c0_83 = arith.constant 0 : index
    %250 = vector.load %arg6[%c0_82, %c0_83] : memref<128x128xbf16, #tpu.memory_space<vmem>>, vector<128x128xbf16>
    %cst_84 = arith.constant dense<0.000000e+00> : vector<8x128xf32>
    %251 = tpu.matmul %249, %250, %cst_84 {dimension_numbers = #tpu.dot_dimension_numbers<[1], [0], [0], [1], [0, 0, 1, 1], [], []>} : vector<8x128xbf16>, vector<128x128xbf16>, vector<8x128xf32> -> vector<8x128xf32>
    %252 = arith.addf %251, %13 : vector<8x128xf32>
    %253 = arith.index_cast %213 : i32 to index
    %c0_85 = arith.constant 0 : index
    %254 = vector.load %arg9[%253, %c0_85] : memref<40x128xf32, #tpu.memory_space<vmem>>, vector<8x128xf32>
    tpu.vector_store %arg9[%253, %c0_85], %252 {strides = array<i32>} : memref<40x128xf32, #tpu.memory_space<vmem>>, vector<8x128xf32>,
    %255 = tpu.bitcast %252 : vector<8x128xf32> -> vector<8x128xi32>
    %c0_i32_86 = arith.constant 0 : i32
    %256 = vector.broadcast %c0_i32_86 : i32 to vector<8x128xi32>
    %257 = arith.cmpi slt, %255, %256 : vector<8x128xi32>
    %c2147483647_i32_87 = arith.constant 2147483647 : i32
    %258 = vector.broadcast %c2147483647_i32_87 : i32 to vector<8x128xi32>
    %259 = arith.xori %255, %258 : vector<8x128xi32>
    %260 = arith.select %257, %259, %255 : vector<8x128xi1>, vector<8x128xi32>
    %c-128_i32_88 = arith.constant -128 : i32
    %261 = vector.broadcast %c-128_i32_88 : i32 to vector<8x128xi32>
    %262 = arith.andi %260, %261 : vector<8x128xi32>
    %263 = arith.ori %262, %21 : vector<8x128xi32>
    %c-2147483648_i32_89 = arith.constant -2147483648 : i32
    %264 = vector.broadcast %c-2147483648_i32_89 : i32 to vector<8x128xi32>
    %265 = arith.select %19, %264, %263 : vector<8x128xi1>, vector<8x128xi32>
    %cst_90 = arith.constant dense<-2147483648> : vector<8xi32>
    %266 = vector.multi_reduction <maxsi>, %265, %cst_90 [1] : vector<8x128xi32> to vector<8xi32>
    %267 = vector.shape_cast %266 : vector<8xi32> to vector<8x1xi32>
    %268 = vector.broadcast %267 : vector<8x1xi32> to vector<8x128xi32>
    %269 = arith.cmpi eq, %265, %268 : vector<8x128xi32>
    %270 = arith.extui %269 : vector<8x128xi1> to vector<8x128xi32>
    %271 = arith.sitofp %270 : vector<8x128xi32> to vector<8x128xf32>
    %272 = arith.truncf %271 : vector<8x128xf32> to vector<8x128xbf16>
    %c4_i32 = arith.constant 4 : i32
    %c8_i32_91 = arith.constant 8 : i32
    %273 = arith.muli %c4_i32, %c8_i32_91 : i32
    %274 = tpu.assume_multiple %273, 8 : i32
    %275 = arith.index_cast %274 : i32 to index
    %c0_92 = arith.constant 0 : index
    %276 = vector.load %arg10[%275, %c0_92] : memref<40x512xf32, #tpu.memory_space<vmem>>, vector<8x512xf32>
    %c0_93 = arith.constant 0 : index
    %c0_94 = arith.constant 0 : index
    %277 = vector.load %arg4[%c0_93, %c0_94] : memref<128x512xbf16, #tpu.memory_space<vmem>>, vector<128x512xbf16>
    %cst_95 = arith.constant dense<0.000000e+00> : vector<8x512xf32>
    %278 = tpu.matmul %272, %277, %cst_95 {dimension_numbers = #tpu.dot_dimension_numbers<[1], [0], [0], [1], [0, 0, 1, 1], [], []>} : vector<8x128xbf16>, vector<128x512xbf16>, vector<8x512xf32> -> vector<8x512xf32>
    %279 = arith.truncf %248 : vector<8x128xf32> to vector<8x128xbf16>
    %c0_96 = arith.constant 0 : index
    %c0_97 = arith.constant 0 : index
    %280 = vector.load %arg5[%c0_96, %c0_97] : memref<128x512xbf16, #tpu.memory_space<vmem>>, vector<128x512xbf16>
    %cst_98 = arith.constant dense<0.000000e+00> : vector<8x512xf32>
    %281 = tpu.matmul %279, %280, %cst_98 {dimension_numbers = #tpu.dot_dimension_numbers<[1], [0], [0], [1], [0, 0, 1, 1], [], []>} : vector<8x128xbf16>, vector<128x512xbf16>, vector<8x512xf32> -> vector<8x512xf32>
    %282 = arith.addf %278, %281 : vector<8x512xf32>
    %283 = arith.addf %282, %276 : vector<8x512xf32>
    %284 = vector.extract_strided_slice %283 {offsets = [0, 0], sizes = [8, 128], strides = [1, 1]} : vector<8x512xf32> to vector<8x128xf32>
    %285 = arith.negf %284 : vector<8x128xf32>
    %286 = math.exp %285 : vector<8x128xf32>
    %cst_99 = arith.constant 1.000000e+00 : f32
    %287 = vector.broadcast %cst_99 : f32 to vector<8x128xf32>
    %288 = arith.addf %287, %286 : vector<8x128xf32>
    %289 = arith.divf %287, %288 : vector<8x128xf32>
    %290 = vector.extract_strided_slice %283 {offsets = [0, 128], sizes = [8, 128], strides = [1, 1]} : vector<8x512xf32> to vector<8x128xf32>
    %291 = arith.negf %290 : vector<8x128xf32>
    %292 = math.exp %291 : vector<8x128xf32>
    %cst_100 = arith.constant 1.000000e+00 : f32
    %293 = vector.broadcast %cst_100 : f32 to vector<8x128xf32>
    %294 = arith.addf %293, %292 : vector<8x128xf32>
    %295 = arith.divf %293, %294 : vector<8x128xf32>
    %296 = vector.extract_strided_slice %283 {offsets = [0, 256], sizes = [8, 128], strides = [1, 1]} : vector<8x512xf32> to vector<8x128xf32>
    %297 = math.tanh %296 : vector<8x128xf32>
    %298 = vector.extract_strided_slice %283 {offsets = [0, 384], sizes = [8, 128], strides = [1, 1]} : vector<8x512xf32> to vector<8x128xf32>
    %299 = arith.negf %298 : vector<8x128xf32>
    %300 = math.exp %299 : vector<8x128xf32>
    %cst_101 = arith.constant 1.000000e+00 : f32
    %301 = vector.broadcast %cst_101 : f32 to vector<8x128xf32>
    %302 = arith.addf %301, %300 : vector<8x128xf32>
    %303 = arith.divf %301, %302 : vector<8x128xf32>
    %304 = arith.mulf %295, %245 : vector<8x128xf32>
    %305 = arith.mulf %289, %297 : vector<8x128xf32>
    %306 = arith.addf %304, %305 : vector<8x128xf32>
    %307 = math.tanh %306 : vector<8x128xf32>
    %308 = arith.mulf %303, %307 : vector<8x128xf32>
    %309 = arith.mulf %308, %10 : vector<8x128xf32>
    %310 = arith.truncf %309 : vector<8x128xf32> to vector<8x128xbf16>
    %c0_102 = arith.constant 0 : index
    %c0_103 = arith.constant 0 : index
    %311 = vector.load %arg6[%c0_102, %c0_103] : memref<128x128xbf16, #tpu.memory_space<vmem>>, vector<128x128xbf16>
    %cst_104 = arith.constant dense<0.000000e+00> : vector<8x128xf32>
    %312 = tpu.matmul %310, %311, %cst_104 {dimension_numbers = #tpu.dot_dimension_numbers<[1], [0], [0], [1], [0, 0, 1, 1], [], []>} : vector<8x128xbf16>, vector<128x128xbf16>, vector<8x128xf32> -> vector<8x128xf32>
    %313 = arith.addf %312, %13 : vector<8x128xf32>
    %314 = arith.index_cast %274 : i32 to index
    %c0_105 = arith.constant 0 : index
    %315 = vector.load %arg9[%314, %c0_105] : memref<40x128xf32, #tpu.memory_space<vmem>>, vector<8x128xf32>
    tpu.vector_store %arg9[%314, %c0_105], %313 {strides = array<i32>} : memref<40x128xf32, #tpu.memory_space<vmem>>, vector<8x128xf32>,
    %316 = tpu.bitcast %313 : vector<8x128xf32> -> vector<8x128xi32>
    %c0_i32_106 = arith.constant 0 : i32
    %317 = vector.broadcast %c0_i32_106 : i32 to vector<8x128xi32>
    %318 = arith.cmpi slt, %316, %317 : vector<8x128xi32>
    %c2147483647_i32_107 = arith.constant 2147483647 : i32
    %319 = vector.broadcast %c2147483647_i32_107 : i32 to vector<8x128xi32>
    %320 = arith.xori %316, %319 : vector<8x128xi32>
    %321 = arith.select %318, %320, %316 : vector<8x128xi1>, vector<8x128xi32>
    %c-128_i32_108 = arith.constant -128 : i32
    %322 = vector.broadcast %c-128_i32_108 : i32 to vector<8x128xi32>
    %323 = arith.andi %321, %322 : vector<8x128xi32>
    %324 = arith.ori %323, %21 : vector<8x128xi32>
    %c-2147483648_i32_109 = arith.constant -2147483648 : i32
    %325 = vector.broadcast %c-2147483648_i32_109 : i32 to vector<8x128xi32>
    %326 = arith.select %19, %325, %324 : vector<8x128xi1>, vector<8x128xi32>
    %cst_110 = arith.constant dense<-2147483648> : vector<8xi32>
    %327 = vector.multi_reduction <maxsi>, %326, %cst_110 [1] : vector<8x128xi32> to vector<8xi32>
    %328 = vector.shape_cast %327 : vector<8xi32> to vector<8x1xi32>
    %329 = vector.broadcast %328 : vector<8x1xi32> to vector<8x128xi32>
    %330 = arith.cmpi eq, %326, %329 : vector<8x128xi32>
    %331 = arith.extui %330 : vector<8x128xi1> to vector<8x128xi32>
    %332 = arith.sitofp %331 : vector<8x128xi32> to vector<8x128xf32>
    %333 = arith.truncf %332 : vector<8x128xf32> to vector<8x128xbf16>
    %c5_i32 = arith.constant 5 : i32
    return
  }
  func.func @transform_0(%arg0: i32) -> (i32, i32) {
    %c0_i32 = arith.constant 0 : i32
    %c0_i32_0 = arith.constant 0 : i32
    return %arg0, %c0_i32 : i32, i32
  }
  func.func @transform_1(%arg0: i32) -> (i32, i32) {
    %c0_i32 = arith.constant 0 : i32
    %c0_i32_0 = arith.constant 0 : i32
    %c0_i32_1 = arith.constant 0 : i32
    return %c0_i32, %c0_i32_0 : i32, i32
  }
  func.func @transform_2(%arg0: i32) -> (i32, i32) {
    %c0_i32 = arith.constant 0 : i32
    %c0_i32_0 = arith.constant 0 : i32
    %c0_i32_1 = arith.constant 0 : i32
    return %c0_i32, %c0_i32_0 : i32, i32
  }
  func.func @transform_3(%arg0: i32) -> (i32, i32) {
    %c0_i32 = arith.constant 0 : i32
    %c0_i32_0 = arith.constant 0 : i32
    %c0_i32_1 = arith.constant 0 : i32
    return %c0_i32, %c0_i32_0 : i32, i32
  }
  func.func @transform_4(%arg0: i32) -> (i32, i32) {
    %c0_i32 = arith.constant 0 : i32
    %c0_i32_0 = arith.constant 0 : i32
    %c0_i32_1 = arith.constant 0 : i32
    return %c0_i32, %c0_i32_0 : i32, i32
  }
  func.func @transform_5(%arg0: i32) -> (i32, i32) {
    %c0_i32 = arith.constant 0 : i32
    %c0_i32_0 = arith.constant 0 : i32
    %c0_i32_1 = arith.constant 0 : i32
    return %c0_i32, %c0_i32_0 : i32, i32
  }
  func.func @transform_6(%arg0: i32) -> (i32, i32) {
    %c0_i32 = arith.constant 0 : i32
    %c0_i32_0 = arith.constant 0 : i32
    %c0_i32_1 = arith.constant 0 : i32
    return %c0_i32, %c0_i32_0 : i32, i32
  }
  func.func @transform_7(%arg0: i32) -> (i32, i32) {
    %c0_i32 = arith.constant 0 : i32
    %c0_i32_0 = arith.constant 0 : i32
    %c0_i32_1 = arith.constant 0 : i32
    return %c0_i32, %c0_i32_0 : i32, i32
  }
  func.func @transform_8(%arg0: i32) -> (i32, i32) {
    %c0_i32 = arith.constant 0 : i32
    %c0_i32_0 = arith.constant 0 : i32
    return %arg0, %c0_i32 : i32, i32
  }
}

</mosaic_0001>

<bundles_post_ra>
// kernel: tpu_custom_call.1
= control target key start
LH: loop header
LB: loop body
LE: loop exit
PB: predicated region body
PF: predicated region fallthrough
CT: control target
= control target key end

     0   :  { %13 = vsyncpa [#allocation4], 0  ;;  %s6070_s0 = inlined_call_operand.hbm [shape: f32[40,64], index: 0, kind: input, shape index: {}]   ;;  %s6071_s1 = inlined_call_operand.hbm [shape: bf16[64,512], index: 1, kind: input, shape index: {}]   ;;  %s6072_s2 = inlined_call_operand.hbm [shape: f32[1,512], index: 2, kind: input, shape index: {}]   ;;  %s6073_s3 = inlined_call_operand.hbm [shape: bf16[128,512], index: 3, kind: input, shape index: {}]   ;;  %s6074_s4 = inlined_call_operand.hbm [shape: bf16[128,512], index: 4, kind: input, shape index: {}]   ;;  %s6075_s5 = inlined_call_operand.hbm [shape: bf16[128,128], index: 5, kind: input, shape index: {}]   ;;  %s6076_s6 = inlined_call_operand.vmem [shape: f32[1,128], index: 6, kind: input, shape index: {}]   ;;  %s6077_s7 = inlined_call_operand.vmem [shape: f32[1,128], index: 7, kind: input, shape index: {}]   ;;  %s6078_s8 = inlined_call_operand.hbm [shape: f32[40,128], index: 8, kind: output, shape index: {}]  }
   0x1   :  { %14 = vsyncpa [#allocation7], 0 }
   0x2   :  { %15 = vsyncpa [#allocation10], 0 }
   0x3   :  { %16 = vsyncpa [#allocation13], 0 }
   0x4   :  { %17 = vsyncpa [#allocation5], 0  ;;  %s5161_s27 = smov [#allocation6]  }
   0x5   :  { %s35_s28 = sshll.u32 %s5161_s27, 4  ;;  %s36_s28 = int_to_ptr.vmem [resolvable:$true] %s35_s28 }
   0x6   :  { %s5019_s29 = scalar_lea.vmem %s36_s28, 2048  ;;  %p5024_p1 = scmp.lt.s32.totalorder %s36_s28, %s36_s28 }
   0x7   :  { %p5020_p0 = scmp.ne.s32.totalorder %s36_s28, %s5019_s29  ;;  %p5025_p2 = scmp.lt.s32.totalorder %s5019_s29, %s5019_s29 }
   0x9   :  { %p5026_p3 = por %p5025_p2, %p5024_p1 }
   0xb   :  { %p5027_p4 = pnand %p5026_p3, %p5020_p0 }
   0xd   :  { %5030 = shalt.err (!%p5027_p4)
}
   0xe   :  { %s5162_s30 = smov 256   ;;  %s5163_s9 = smov 16  }
   0xf   :  { %41 = dma.hbm_to_vmem [thread:$0]  %s6071_s1, 2048, %s36_s28, [#allocation7], %s5162_s30, %s5162_s30, %s5163_s9  }
  0x10   :  { %s5164_s12 = smov [#allocation9]   ;;  %s5165_s14 = smov [#allocation3]  }
  0x11   :  { %s57_s13 = sshll.u32 %s5164_s12, 4  ;;  %s23_s15 = sshll.u32 %s5165_s14, 4  ;;  %s58_s13 = int_to_ptr.vmem [resolvable:$true] %s57_s13  ;;  %s24_s15 = int_to_ptr.vmem [resolvable:$true] %s23_s15 }
  0x12   :  { %s5039_s16 = scalar_lea.vmem %s58_s13, 4096  ;;  %p5044_p6 = scmp.lt.s32.totalorder %s58_s13, %s58_s13 }
  0x13   :  { %p5040_p5 = scmp.ne.s32.totalorder %s58_s13, %s5039_s16  ;;  %p5045_p7 = scmp.lt.s32.totalorder %s5039_s16, %s5039_s16 }
  0x15   :  { %p5046_p8 = por %p5045_p7, %p5044_p6 }
  0x17   :  { %p5047_p9 = pnand %p5046_p8, %p5040_p5 }
  0x19   :  { %5050 = shalt.err (!%p5047_p9)
}
  0x1a   :  { %63 = dma.hbm_to_vmem [thread:$0]  %s6073_s3, 4096, %s58_s13, [#allocation10], %s5162_s30, %s5162_s30, %s5163_s9  }
  0x1b   :  { %s5059_s1 = scalar_lea.vmem %s24_s15, 640  ;;  %p5064_p11 = scmp.lt.s32.totalorder %s24_s15, %s24_s15 }
  0x1c   :  { %p5060_p10 = scmp.ne.s32.totalorder %s24_s15, %s5059_s1  ;;  %p5065_p12 = scmp.lt.s32.totalorder %s5059_s1, %s5059_s1 }
  0x1e   :  { %p5066_p13 = por %p5065_p12, %p5064_p11 }
  0x20   :  { %p5067_p0 = pnand %p5066_p13, %p5060_p10 }
  0x22   :  { %5070 = shalt.err (!%p5067_p0)
}
  0x23   :  { %s5166_s19 = smov 128   ;;  %s5167_s20 = smov 8  }
  0x24   :  { %29 = dma.hbm_to_vmem [thread:$0]  %s6070_s0, 640, %s24_s15, [#allocation4], %s5166_s19, %s5166_s19, %s5167_s20  }
  0x25   :  { %s5168_s23 = smov [#allocation8]   ;;  %s5169_s3 = smov [#allocation11]  }
  0x26   :  { %s48_s24 = sshll.u32 %s5168_s23, 4  ;;  %s69_s25 = sshll.u32 %s5169_s3, 4  ;;  %s49_s24 = int_to_ptr.vmem [resolvable:$true] %s48_s24  ;;  %s70_s25 = int_to_ptr.vmem [resolvable:$true] %s69_s25 }
  0x27   :  { %s5079_s26 = scalar_lea.vmem %s49_s24, 64  ;;  %p5084_p2 = scmp.lt.s32.totalorder %s49_s24, %s49_s24 }
  0x28   :  { %p5080_p1 = scmp.ne.s32.totalorder %s49_s24, %s5079_s26  ;;  %p5085_p3 = scmp.lt.s32.totalorder %s5079_s26, %s5079_s26 }
  0x2a   :  { %p5086_p4 = por %p5085_p3, %p5084_p2 }
  0x2c   :  { %p5087_p5 = pnand %p5086_p4, %p5080_p1 }
  0x2e   :  { %5090 = shalt.err (!%p5087_p5)
}
  0x2f   :  { %51 = dma.hbm_to_vmem [thread:$0]  %s6072_s2, 64, %s49_s24, [#allocation7]  }
  0x30   :  { %s5099_s29 = scalar_lea.vmem %s70_s25, 4096  ;;  %p5104_p7 = scmp.lt.s32.totalorder %s70_s25, %s70_s25 }
  0x31   :  { %p5100_p6 = scmp.ne.s32.totalorder %s70_s25, %s5099_s29  ;;  %p5105_p8 = scmp.lt.s32.totalorder %s5099_s29, %s5099_s29 }
  0x33   :  { %p5106_p9 = por %p5105_p8, %p5104_p7 }
  0x35   :  { %p5107_p10 = pnand %p5106_p9, %p5100_p6 }
  0x37   :  { %5110 = shalt.err (!%p5107_p10)
}
  0x38   :  { %75 = dma.hbm_to_vmem [thread:$0]  %s6074_s4, 4096, %s70_s25, [#allocation10], %s5162_s30, %s5162_s30, %s5163_s9  }
  0x39   :  { %s5170_s11 = smov [#allocation12]  }
  0x3a   :  { %s81_s12 = sshll.u32 %s5170_s11, 4  ;;  %s82_s12 = int_to_ptr.vmem [resolvable:$true] %s81_s12 }
  0x3b   :  { %s5119_s13 = scalar_lea.vmem %s82_s12, 1024  ;;  %p5124_p12 = scmp.lt.s32.totalorder %s82_s12, %s82_s12 }
  0x3c   :  { %p5120_p11 = scmp.ne.s32.totalorder %s82_s12, %s5119_s13  ;;  %p5125_p13 = scmp.lt.s32.totalorder %s5119_s13, %s5119_s13 }
  0x3e   :  { %p5126_p0 = por %p5125_p13, %p5124_p12 }
  0x40   :  { %p5127_p1 = pnand %p5126_p0, %p5120_p11 }
  0x42   :  { %5130 = shalt.err (!%p5127_p1)
}
  0x43   :  { %s5171_s2 = smov 64   ;;  %s5172_s14 = smov 4  }
  0x44   :  { %87 = dma.hbm_to_vmem [thread:$0]  %s6075_s5, 1024, %s82_s12, [#allocation13], %s5171_s2, %s5171_s2, %s5172_s14  }
  0x45   :  { %5151 = dma.done.wait [#allocation4], 640  }
  0x46   :  { %5152 = vsyncadd [#allocation4], 4294966656 }
  0x47   :  { %5153 = dma.done.wait [#allocation7], 2112  }
  0x48   :  { %5154 = vsyncadd [#allocation7], 4294965184 }
  0x49   :  { %5155 = dma.done.wait [#allocation10], 8192  }
  0x4a   :  { %5156 = vsyncadd [#allocation10], 4294959104 }
  0x4b   :  { %5157 = dma.done.wait [#allocation13], 1024  }
  0x4c   :  { %5158 = vsyncadd [#allocation13], 4294966272  ;;  %v6080_v0 = vmov 0   ;;  %v4576_v1 = vld [vmem:[#allocation6 + $0x64] ss:$16 sps:$4 sm:$0xff]   ;;  %v111_v17 = vld [vmem:[#allocation3] sm:$0xff]  ;;  %v6079_v55 = vlaneseq }
  0x4d   :  { %279 = vmatprep.mubr.bf16.mxu1 %v6080_v0  ;;  %675 = vmatprep.mubr.bf16.mxu0 %v6080_v0  ;;  %v5255_v2 = vld [vmem:[#allocation11 + $0xe4] ss:$16 sps:$4 sm:$0xff]   ;;  %v4580_v3 = vld [vmem:[#allocation6 + $0x60] ss:$16 sps:$4 sm:$0xff]   ;;  %v5257_v4 = vld [vmem:[#allocation11 + $0xe0] ss:$16 sps:$4 sm:$0xff]  }
  0x4e   :  { %255 = vmatprep.subr.bf16.mxu1 %v4576_v1  ;;  %643 = vmatprep.subr.bf16.mxu0 %v5255_v2  ;;  %v4582_v5 = vld [vmem:[#allocation6 + $0x44] ss:$16 sps:$4 sm:$0xff]   ;;  %v5261_v6 = vld [vmem:[#allocation11 + $0xc4] ss:$16 sps:$4 sm:$0xff]   ;;  %v4586_v7 = vld [vmem:[#allocation6 + $0x40] ss:$16 sps:$4 sm:$0xff]  }
  0x4f   :  { %256 = vmatpush1.bf16.msra.mxu1 %v4580_v3  ;;  %644 = vmatpush1.bf16.msra.mxu0 %v5257_v4  ;;  %v5263_v8 = vld [vmem:[#allocation11 + $0xc0] ss:$16 sps:$4 sm:$0xff]   ;;  %v5266_v10 = vld [vmem:[#allocation11 + $0xa4] ss:$16 sps:$4 sm:$0xff]   ;;  %v4592_v11 = vld [vmem:[#allocation6 + $0x20] ss:$16 sps:$4 sm:$0xff]  }
  0x50   :  { %257 = vmatprep.subr.bf16.mxu1 %v4582_v5  ;;  %645 = vmatprep.subr.bf16.mxu0 %v5261_v6  ;;  %v4588_v9 = vld [vmem:[#allocation6 + $0x24] ss:$16 sps:$4 sm:$0xff]   ;;  %v5272_v14 = vld [vmem:[#allocation11 + $0x84] ss:$16 sps:$4 sm:$0xff]   ;;  %v4598_v15 = vld [vmem:[#allocation6] ss:$16 sps:$4 sm:$0xff]  }
  0x51   :  { %v5268_v12 = vld [vmem:[#allocation11 + $0xa0] ss:$16 sps:$4 sm:$0xff]   ;;  %v4602_v19 = vld [vmem:[#allocation6 + $0x6c] ss:$16 sps:$4 sm:$0xff]   ;;  %v5278_v20 = vld [vmem:[#allocation11 + $0x64] ss:$16 sps:$4 sm:$0xff]  }
  0x52   :  { %v4594_v13 = vld [vmem:[#allocation6 + $0x4] ss:$16 sps:$4 sm:$0xff]   ;;  %vm237_vm0 = vcmask 523264   ;;  %v4600_v22 = vld [vmem:[#allocation6 + $0x68] ss:$16 sps:$4 sm:$0xff]   ;;  %v5368_v60 = vand.u32 127, %v6079_v55 }
  0x53   :  { %258 = vmatpush1.bf16.msra.mxu1 %v4586_v7  ;;  %646 = vmatpush1.bf16.msra.mxu0 %v5263_v8  ;;  %v5274_v16 = vld [vmem:[#allocation11 + $0x80] ss:$16 sps:$4 sm:$0xff]   ;;  %v5285_v24 = vld [vmem:[#allocation11 + $0x44] ss:$16 sps:$4 sm:$0xff]   ;;  %v4611_v25 = vld [vmem:[#allocation6 + $0x4c] ss:$16 sps:$4 sm:$0xff]  }
  0x54   :  { %259 = vmatprep.subr.bf16.mxu1 %v4588_v9  ;;  %647 = vmatprep.subr.bf16.mxu0 %v5266_v10  ;;  %v112_v18 = vld [vmem:[#allocation3 + $0x8] sm:$0xff]  ;;  %v4609_v27 = vld [vmem:[#allocation6 + $0x48] ss:$16 sps:$4 sm:$0xff]   ;;  %v114_v29 = vld [vmem:[#allocation3 + $0x18] sm:$0xff]  ;;  %6117 = vst [vmem:[#allocation20_spill] sm:$0xff] %v5368_v60  ;;  %vm405_vm1 = vcmp.eq.s32.totalorder %v5368_v60, 0 }
  0x55   :  { %v5280_v21 = vpack.c.bf16 %v112_v18, %v111_v17  ;;  %v5283_v23 = vld [vmem:[#allocation11 + $0x60] ss:$16 sps:$4 sm:$0xff]   ;;  %v113_v28 = vld [vmem:[#allocation3 + $0x10] sm:$0xff]  ;;  %v115_v38 = vld [vmem:[#allocation3 + $0x20] sm:$0xff]  ;;  %vm5176_vm3 = vmmov 0  }
  0x56   :  { %v5288_v26 = vld [vmem:[#allocation11 + $0x40] ss:$16 sps:$4 sm:$0xff]   ;;  %v5294_v30 = vld [vmem:[#allocation11 + $0x24] ss:$16 sps:$4 sm:$0xff]   ;;  %v4617_v31 = vld [vmem:[#allocation6 + $0x2c] ss:$16 sps:$4 sm:$0xff]   ;;  %v117_v32 = vpack.c.bf16 %v114_v29, %v113_v28  ;;  %v5313_v42 = vpack.c.bf16 %v115_v38, %v115_v38 }
  0x57   :  { %260 = vmatpush1.bf16.msra.mxu1 %v4592_v11  ;;  %648 = vmatpush1.bf16.msra.mxu0 %v5268_v12  ;;  %v5297_v33 = vld [vmem:[#allocation11 + $0x20] ss:$16 sps:$4 sm:$0xff]   ;;  %v4615_v34 = vld [vmem:[#allocation6 + $0x28] ss:$16 sps:$4 sm:$0xff]   ;;  %v4626_v37 = vld [vmem:[#allocation6 + $0xc] ss:$16 sps:$4 sm:$0xff]  }
  0x58   :  { %261 = vmatprep.subr.bf16.mxu1 %v4594_v13  ;;  %649 = vmatprep.subr.bf16.mxu0 %v5272_v14  ;;  %v5301_v35 = vld [vmem:[#allocation11 + $0x4] ss:$16 sps:$4 sm:$0xff]   ;;  %v5303_v36 = vld [vmem:[#allocation11] ss:$16 sps:$4 sm:$0xff]   ;;  %v5311_v41 = vld [vmem:[#allocation11 + $0xec] ss:$16 sps:$4 sm:$0xff]  }
  0x59   :  { %v4624_v39 = vld [vmem:[#allocation6 + $0x8] ss:$16 sps:$4 sm:$0xff]   ;;  %v4621_v43 = vld [vmem:[#allocation9 + $0xe0] ss:$16 sps:$4 sm:$0xff]   ;;  %v5330_v47 = vld [vmem:[#allocation11 + $0xe8] ss:$16 sps:$4 sm:$0xff]  }
  0x5a   :  { %v5309_v40 = vld [vmem:[#allocation9 + $0xe4] ss:$16 sps:$4 sm:$0xff]   ;;  %v5323_v45 = vld [vmem:[#allocation9 + $0xc0] ss:$16 sps:$4 sm:$0xff]   ;;  %v5336_v49 = vld [vmem:[#allocation11 + $0xcc] ss:$16 sps:$4 sm:$0xff]  }
  0x5b   :  { %262 = vmatpush1.bf16.msra.mxu1 %v4598_v15  ;;  %650 = vmatpush1.bf16.msra.mxu0 %v5274_v16  ;;  %v5317_v44 = vld [vmem:[#allocation9 + $0xc4] ss:$16 sps:$4 sm:$0xff]   ;;  %v5333_v48 = vld [vmem:[#allocation9 + $0xa0] ss:$16 sps:$4 sm:$0xff]   ;;  %v5342_v51 = vld [vmem:[#allocation11 + $0xc8] ss:$16 sps:$4 sm:$0xff]  }
  0x5c   :  { %316 = vmatprep.subr.bf16.mxu1 %v4602_v19  ;;  %651 = vmatprep.subr.bf16.mxu0 %v5278_v20  ;;  %v5327_v46 = vld [vmem:[#allocation9 + $0xa4] ss:$16 sps:$4 sm:$0xff]   ;;  %v5346_v52 = vld [vmem:[#allocation9 + $0x80] ss:$16 sps:$4 sm:$0xff]   ;;  %v5350_v53 = vld [vmem:[#allocation11 + $0xac] ss:$16 sps:$4 sm:$0xff]  }
  0x5d   :  { %v5338_v50 = vld [vmem:[#allocation9 + $0x84] ss:$16 sps:$4 sm:$0xff]   ;;  %v5355_v56 = vld [vmem:[#allocation11 + $0xa8] ss:$16 sps:$4 sm:$0xff]   ;;  %v5359_v57 = vld [vmem:[#allocation9 + $0x60] ss:$16 sps:$4 sm:$0xff]  }
  0x5e   :  { %4006 = vmatmul.mubr.msk.bf16.vlgmr.msra.gmra.mxu1 %vm237_vm0, %v5280_v21  ;;  %v5352_v54 = vld [vmem:[#allocation9 + $0x64] ss:$16 sps:$4 sm:$0xff]   ;;  %v5363_v58 = vld [vmem:[#allocation11 + $0x8c] ss:$16 sps:$4 sm:$0xff]   ;;  %v5371_v61 = vld [vmem:[#allocation11 + $0x88] ss:$16 sps:$4 sm:$0xff]  }
  0x5f   :  { %317 = vmatpush1.bf16.msra.mxu1 %v4600_v22  ;;  %652 = vmatpush1.bf16.msra.mxu0 %v5283_v23  ;;  %v5365_v59 = vld [vmem:[#allocation9 + $0x44] ss:$16 sps:$4 sm:$0xff]   ;;  %v5375_v62 = vld [vmem:[#allocation9 + $0x40] ss:$16 sps:$4 sm:$0xff]   ;;  %v5379_v63 = vld [vmem:[#allocation11 + $0x6c] ss:$16 sps:$4 sm:$0xff]  }
  0x60   :  { %653 = vmatprep.subr.bf16.mxu0 %v5285_v24  ;;  %318 = vmatprep.subr.bf16.mxu1 %v4611_v25  ;;  %v5381_v1 = vld [vmem:[#allocation9 + $0x24] ss:$16 sps:$4 sm:$0xff]   ;;  %v5384_v3 = vld [vmem:[#allocation11 + $0x68] ss:$16 sps:$4 sm:$0xff]   ;;  %v5386_v5 = vld [vmem:[#allocation9 + $0x20] ss:$16 sps:$4 sm:$0xff]  }
  0x61   :  { %289 = vmatprep.mubr.bf16.mxu1 %v6080_v0  ;;  %v5389_v7 = vld [vmem:[#allocation11 + $0x4c] ss:$16 sps:$4 sm:$0xff]   ;;  %v5391_v9 = vld [vmem:[#allocation9 + $0x4] ss:$16 sps:$4 sm:$0xff]   ;;  %vm5398_vm2 = vmpackc.low %vm405_vm1, %vm405_vm1  ;;  %v6082_v22 = vmov 1.0|1.0  }
  0x62   :  { %v5404_v13 = vld [vmem:[#allocation11 + $0x48] ss:$16 sps:$4 sm:$0xff]   ;;  %v5406_v15 = vld [vmem:[#allocation9] ss:$16 sps:$4 sm:$0xff]   ;;  %v5410_v17 = vld [vmem:[#allocation11 + $0x2c] ss:$16 sps:$4 sm:$0xff]  }
  0x63   :  { %654 = vmatpush1.bf16.msra.mxu0 %v5288_v26  ;;  %319 = vmatpush1.bf16.msra.mxu1 %v4609_v27  ;;  %v5416_v18 = vld [vmem:[#allocation11 + $0x28] ss:$16 sps:$4 sm:$0xff]   ;;  %v5419_v19 = vld [vmem:[#allocation11 + $0xc] ss:$16 sps:$4 sm:$0xff]  }
  0x64   :  { %655 = vmatprep.subr.bf16.mxu0 %v5294_v30  ;;  %320 = vmatprep.subr.bf16.mxu1 %v4617_v31  ;;  %v5429_v25 = vld [vmem:[#allocation9 + $0xec] ss:$16 sps:$4 sm:$0xff]   ;;  %v5433_v27 = vld [vmem:[#allocation9 + $0xe8] ss:$16 sps:$4 sm:$0xff]  }
  0x65   :  { %v5435_v28 = vld [vmem:[#allocation9 + $0xcc] ss:$16 sps:$4 sm:$0xff]   ;;  %v5439_v29 = vld [vmem:[#allocation9 + $0xc8] ss:$16 sps:$4 sm:$0xff]  }
  0x66   :  { %4007 = vmatmul.mubr.msk.bf16.gmra.mxu1 %vm237_vm0, %v117_v32  ;;  %v5442_v31 = vld [vmem:[#allocation9 + $0xac] ss:$16 sps:$4 sm:$0xff]   ;;  %v5477_v60 = vld [vmem:[#allocation9 + $0x8] ss:$16 sps:$4 sm:$0xff]  }
  0x67   :  { %656 = vmatpush1.bf16.msra.mxu0 %v5297_v33  ;;  %321 = vmatpush1.bf16.msra.mxu1 %v4615_v34  ;;  %v5449_v34 = vld [vmem:[#allocation9 + $0x8c] ss:$16 sps:$4 sm:$0xff]   ;;  %6127 = vst [vmem:[#allocation28_spill] sm:$0xff] %v5477_v60 }
  0x68   :  { %657 = vmatprep.subr.bf16.mxu0 %v5301_v35  ;;  %299 = vmatprep.mubr.bf16.mxu1 %v6080_v0  ;;  %v5455_v38 = vld [vmem:[#allocation9 + $0x6c] ss:$16 sps:$4 sm:$0xff]  }
  0x69   :  { %322 = vmatprep.subr.bf16.mxu1 %v4626_v37  ;;  %v5453_v37 = vld [vmem:[#allocation9 + $0x88] ss:$16 sps:$4 sm:$0xff]   ;;  %6120 = vst [vmem:[#allocation21_spill] sm:$0xff] %v5455_v38  ;;  %v5467_v55 = vld [vmem:[#allocation9 + $0x2c] ss:$16 sps:$4 sm:$0xff]  }
  0x6a   :  { %6124 = vst [vmem:[#allocation25_spill] sm:$0xff] %v5467_v55 }
  0x6b   :  { %658 = vmatpush1.bf16.msra.mxu0 %v5303_v36  ;;  %323 = vmatpush1.bf16.msra.mxu1 %v4624_v39  ;;  %v5459_v39 = vld [vmem:[#allocation9 + $0x68] ss:$16 sps:$4 sm:$0xff]  }
  0x6c   :  { %885 = vmatprep.subr.bf16.mxu0 %v5309_v40  ;;  %684 = vmatprep.subr.bf16.mxu1 %v5311_v41  ;;  %6121 = vst [vmem:[#allocation22_spill] sm:$0xff] %v5459_v39 }
  0x6e   :  { %4008 = vmatmul.mubr.msk.bf16.gmra.mxu1 %vm237_vm0, %v5313_v42  ;;  %676 = vmatmul.mubr.bf16.vlgmr.msra.gmra.mxu0 %v6080_v0 }
  0x6f   :  { %886 = vmatpush1.bf16.msra.mxu0 %v4621_v43  ;;  %340 = vmatprep.mubr.bf16.mxu1 %v6080_v0  ;;  %v5465_v43 = vld [vmem:[#allocation9 + $0x48] ss:$16 sps:$4 sm:$0xff]  }
  0x70   :  { %887 = vmatprep.subr.bf16.mxu0 %v5317_v44  ;;  %917 = vmatprep.mubr.bf16.mxu0 %v6080_v0  ;;  %6123 = vst [vmem:[#allocation24_spill] sm:$0xff] %v5465_v43 }
  0x73   :  { %888 = vmatpush1.bf16.msra.mxu0 %v5323_v45 }
  0x74   :  { %889 = vmatprep.subr.bf16.mxu0 %v5327_v46 }
  0x76   :  { %4009 = vmatmul.mubr.msk.bf16.vlgmr.msra.gmra.mxu1 %vm237_vm0, %v5280_v21  ;;  %v5424_v21 = vld [vmem:[#allocation11 + $0x8] ss:$16 sps:$4 sm:$0xff]  }
  0x77   :  { %685 = vmatpush1.bf16.msra.mxu1 %v5330_v47  ;;  %890 = vmatpush1.bf16.msra.mxu0 %v5333_v48 }
  0x78   :  { %686 = vmatprep.subr.bf16.mxu1 %v5336_v49  ;;  %891 = vmatprep.subr.bf16.mxu0 %v5338_v50 }
  0x79   :  { %350 = vmatprep.mubr.bf16.mxu1 %v6080_v0 }
  0x7b   :  { %687 = vmatpush1.bf16.msra.mxu1 %v5342_v51  ;;  %892 = vmatpush1.bf16.msra.mxu0 %v5346_v52 }
  0x7c   :  { %688 = vmatprep.subr.bf16.mxu1 %v5350_v53  ;;  %893 = vmatprep.subr.bf16.mxu0 %v5352_v54 }
  0x7e   :  { %4010 = vmatmul.mubr.msk.bf16.gmra.mxu1 %vm237_vm0, %v117_v32  ;;  %v5447_v32 = vld [vmem:[#allocation9 + $0xa8] ss:$16 sps:$4 sm:$0xff]  }
  0x7f   :  { %689 = vmatpush1.bf16.msra.mxu1 %v5355_v56  ;;  %894 = vmatpush1.bf16.msra.mxu0 %v5359_v57 }
  0x80   :  { %690 = vmatprep.subr.bf16.mxu1 %v5363_v58  ;;  %895 = vmatprep.subr.bf16.mxu0 %v5365_v59 }
  0x81   :  { %360 = vmatprep.mubr.bf16.mxu1 %v6080_v0 }
  0x83   :  { %691 = vmatpush1.bf16.msra.mxu1 %v5371_v61  ;;  %896 = vmatpush1.bf16.msra.mxu0 %v5375_v62 }
  0x84   :  { %692 = vmatprep.subr.bf16.mxu1 %v5379_v63  ;;  %897 = vmatprep.subr.bf16.mxu0 %v5381_v1 }
  0x86   :  { %4011 = vmatmul.mubr.msk.bf16.gmra.mxu1 %vm237_vm0, %v5313_v42  ;;  %v5461_v42 = vld [vmem:[#allocation9 + $0x4c] ss:$16 sps:$4 sm:$0xff]  }
  0x87   :  { %693 = vmatpush1.bf16.msra.mxu1 %v5384_v3  ;;  %898 = vmatpush1.bf16.msra.mxu0 %v5386_v5  ;;  %6122 = vst [vmem:[#allocation23_spill] sm:$0xff] %v5461_v42 }
  0x88   :  { %694 = vmatprep.subr.bf16.mxu1 %v5389_v7  ;;  %899 = vmatprep.subr.bf16.mxu0 %v5391_v9 }
  0x89   :  { %716 = vmatprep.mubr.bf16.mxu1 %v6080_v0 }
  0x8b   :  { %695 = vmatpush1.bf16.msra.mxu1 %v5404_v13  ;;  %900 = vmatpush1.bf16.msra.mxu0 %v5406_v15 }
  0x8c   :  { %696 = vmatprep.subr.bf16.mxu1 %v5410_v17 }
  0x8e   :  { %4080 = vmatmul.mubr.msk.bf16.vlgmr.msra.gmra.mxu0 %vm5398_vm2, %v6082_v22  ;;  %v5473_v22 = vld [vmem:[#allocation9 + $0xc] ss:$16 sps:$4 sm:$0xff]  }
  0x8f   :  { %697 = vmatpush1.bf16.msra.mxu1 %v5416_v18  ;;  %6126 = vst [vmem:[#allocation27_spill] sm:$0xff] %v5473_v22 }
  0x90   :  { %698 = vmatprep.subr.bf16.mxu1 %v5419_v19 }
  0x93   :  { %699 = vmatpush1.bf16.msra.mxu1 %v5424_v21 }
  0x94   :  { %926 = vmatprep.subr.bf16.mxu1 %v5429_v25 }
  0x96   :  { %717 = vmatmul.mubr.bf16.vlgmr.msra.gmra.mxu1 %v6080_v0 }
  0x97   :  { %927 = vmatpush1.bf16.msra.mxu1 %v5433_v27  ;;  %958 = vmatprep.mubr.bf16.mxu1 %v6080_v0  ;;  %v5471_v0 = vld [vmem:[#allocation9 + $0x28] ss:$16 sps:$4 sm:$0xff]  }
  0x98   :  { %928 = vmatprep.subr.bf16.mxu1 %v5435_v28  ;;  %6125 = vst [vmem:[#allocation26_spill] sm:$0xff] %v5471_v0 }
  0x9b   :  { %929 = vmatpush1.bf16.msra.mxu1 %v5439_v29 }
  0x9c   :  { %930 = vmatprep.subr.bf16.mxu1 %v5442_v31 }
  0x9f   :  { %931 = vmatpush1.bf16.msra.mxu1 %v5447_v32 }
  0xa0   :  { %932 = vmatprep.subr.bf16.mxu1 %v5449_v34 }
  0xa3   :  { %933 = vmatpush1.bf16.msra.mxu1 %v5453_v37 }
  0xa4   :  { %934 = vmatprep.subr.bf16.mxu1 %v5455_v38 }
  0xa7   :  { %935 = vmatpush1.bf16.msra.mxu1 %v5459_v39  ;;  %v6128_v39 = vmov 1.0|1.0  }
  0xa8   :  { %936 = vmatprep.subr.bf16.mxu1 %v5461_v42  ;;  %v6129_v42 = vmov 0  }
  0xab   :  { %937 = vmatpush1.bf16.msra.mxu1 %v5465_v43 }
  0xac   :  { %938 = vmatprep.subr.bf16.mxu1 %v5467_v55 }
  0xaf   :  { %939 = vmatpush1.bf16.msra.mxu1 %v5471_v0 }
  0xb0   :  { %940 = vmatprep.subr.bf16.mxu1 %v5473_v22 }
  0xb3   :  { %941 = vmatpush1.bf16.msra.mxu1 %v5477_v60 }
  0xb4   :  { %1358 = vmatprep.subr.bf16.mxu1 %v5255_v2  ;;  %v4696_v2 = vld [vmem:[#allocation12 + $0x38] sm:$0xff]  }
  0xb6   :  { %4082 = vmatmul.mubr.msk.bf16.vlgmr.msra.gmra.mxu1 %vm5398_vm2, %v6128_v39 }
  0xb7   :  { %1359 = vmatpush1.bf16.msra.mxu1 %v5257_v4  ;;  %1390 = vmatprep.mubr.bf16.mxu1 %v6129_v42  ;;  %v6088_v4 = vmov 0.0  }
  0xb8   :  { %1360 = vmatprep.subr.bf16.mxu1 %v5261_v6  ;;  %4459 = vmatprep.subr.bf16.mxu0 %v6088_v4  ;;  %v4697_v6 = vld [vmem:[#allocation12 + $0x30] sm:$0xff]  }
  0xb9   :  { %4460 = vmatpush3.bf16.msra.mxu0 %v4696_v2  ;;  %4475 = vmatprep.mubr.msk.bf16.mxu0 %vm5176_vm3, %v6088_v4 }
  0xba   :  { %4461 = vmatprep.subr.bf16.mxu0 %v6088_v4 }
  0xbb   :  { %1361 = vmatpush1.bf16.msra.mxu1 %v5263_v8  ;;  %v4698_v8 = vld [vmem:[#allocation12 + $0x28] sm:$0xff]  }
  0xbc   :  { %1362 = vmatprep.subr.bf16.mxu1 %v5266_v10  ;;  %v4699_v10 = vld [vmem:[#allocation12 + $0x20] sm:$0xff]  }
  0xbd   :  { %4462 = vmatpush3.bf16.msra.mxu0 %v4697_v6 }
  0xbe   :  { %4463 = vmatprep.subr.bf16.mxu0 %v6088_v4 }
  0xbf   :  { %1363 = vmatpush1.bf16.msra.mxu1 %v5268_v12  ;;  %v4700_v12 = vld [vmem:[#allocation12 + $0x18] sm:$0xff]  }
  0xc0   :  { %1364 = vmatprep.subr.bf16.mxu1 %v5272_v14  ;;  %v6130_v14 = vlaneseq }
  0xc1   :  { %4464 = vmatpush3.bf16.msra.mxu0 %v4698_v8 }
  0xc2   :  { %4465 = vmatprep.subr.bf16.mxu0 %v6088_v4 }
  0xc3   :  { %1365 = vmatpush1.bf16.msra.mxu1 %v5274_v16  ;;  %v138_v16 = vshrl.u32 %v6130_v14, 7 }
  0xc4   :  { %1366 = vmatprep.subr.bf16.mxu1 %v5278_v20  ;;  %v4701_v20 = vld [vmem:[#allocation12 + $0x10] sm:$0xff]  }
  0xc5   :  { %4466 = vmatpush3.bf16.msra.mxu0 %v4699_v10 }
  0xc6   :  { %4467 = vmatprep.subr.bf16.mxu0 %v6088_v4 }
  0xc7   :  { %1367 = vmatpush1.bf16.msra.mxu1 %v5283_v23  ;;  %v139_v23 = vsub.s32 0, %v138_v16 }
  0xc8   :  { %1368 = vmatprep.subr.bf16.mxu1 %v5285_v24  ;;  %v4702_v24 = vld [vmem:[#allocation12 + $0x8] sm:$0xff]  }
  0xc9   :  { %4468 = vmatpush3.bf16.msra.mxu0 %v4700_v12 }
  0xca   :  { %4469 = vmatprep.subr.bf16.mxu0 %v6088_v4 }
  0xcb   :  { %1369 = vmatpush1.bf16.msra.mxu1 %v5288_v26  ;;  %v135_v26 = vld [vmem:[#allocation8] sm:$0xf] }
  0xcc   :  { %1370 = vmatprep.subr.bf16.mxu1 %v5294_v30  ;;  %v143_v30 = vsub.s32 1, %v138_v16 }
  0xcd   :  { %4470 = vmatpush3.bf16.msra.mxu0 %v4701_v20 }
  0xce   :  { %4471 = vmatprep.subr.bf16.mxu0 %v6088_v4 }
  0xcf   :  { %1371 = vmatpush1.bf16.msra.mxu1 %v5297_v33  ;;  %v140_v33 = vrot.slane %v135_v26, %v139_v23 }
  0xd0   :  { %1372 = vmatprep.subr.bf16.mxu1 %v5301_v35  ;;  %v4703_v35 = vld [vmem:[#allocation12] sm:$0xff]  }
  0xd1   :  { %4472 = vmatpush3.bf16.msra.mxu0 %v4702_v24 }
  0xd2   :  { %4473 = vmatprep.subr.bf16.mxu0 %v6088_v4 }
  0xd3   :  { %1373 = vmatpush1.bf16.msra.mxu1 %v5303_v36  ;;  %v144_v36 = vrot.slane %v135_v26, %v143_v30 }
  0xd4   :  { %1600 = vmatprep.subr.bf16.mxu1 %v5309_v40 }
  0xd5   :  { %4474 = vmatpush3.bf16.msra.mxu0 %v4703_v35 }
  0xd6   :  { %1399 = vmatprep.subr.bf16.mxu0 %v5311_v41 }
 0x11e   :  { %v281_v40 = vpop.f32.mrf.mxu1 }
 0x11f   :  { %v5514_v11 = vadd.f32 %v281_v40, %v140_v33 }
 0x120   :  { %v283_v2 = vpop.f32.mrf.mxu1 }
 0x121   :  { %v284_v6 = vadd.f32 %v283_v2, %v144_v36 }
 0x122   :  { %v285_v8 = vpop.f32.mrf.mxu1 }
 0x123   :  { %v5517_v10 = vadd.f32 %v285_v8, %v140_v33  ;;  %v147_v8 = vsub.s32 2, %v138_v16 }
 0x124   :  { %v287_v12 = vpop.f32.mrf.mxu1 }
 0x125   :  { %6131 = vst [vmem:[#allocation29_spill] sm:$0xff] %v5517_v10  ;;  %v5519_v14 = vadd.f32 %v287_v12, %v144_v36 }
 0x126   :  { %v291_v20 = vpop.f32.mrf.mxu1 }
 0x127   :  { %6132 = vst [vmem:[#allocation30_spill] sm:$0xff] %v5519_v14  ;;  %v5521_v23 = vadd.f32 %v291_v20, %v140_v33  ;;  %v151_v20 = vsub.s32 3, %v138_v16 }
 0x128   :  { %v293_v24 = vpop.f32.mrf.mxu1 }
 0x129   :  { %6133 = vst [vmem:[#allocation31_spill] sm:$0xff] %v5521_v23  ;;  %v5523_v4 = vadd.f32 %v293_v24, %v144_v36  ;;  %v148_v24 = vrot.slane %v135_v26, %v147_v8 }
 0x12a   :  { %v295_v30 = vpop.f32.mrf.mxu1 }
 0x12b   :  { %6134 = vst [vmem:[#allocation32_spill] sm:$0xff] %v5523_v4  ;;  %v5525_v40 = vadd.f32 %v295_v30, %v140_v33  ;;  %v152_v30 = vrot.slane %v135_v26, %v151_v20 }
 0x12c   :  { %v297_v35 = vpop.f32.mrf.mxu1 }
 0x12d   :  { %6135 = vst [vmem:[#allocation33_spill] sm:$0xff] %v5525_v40  ;;  %v5527_v39 = vadd.f32 %v297_v35, %v144_v36 }
 0x12e   :  { %v301_v41 = vpop.f32.mrf.mxu1  ;;  %v677_v2 = vpop.f32.mrf.mxu0 }
 0x12f   :  { %6136 = vst [vmem:[#allocation34_spill] sm:$0xff] %v5527_v39  ;;  %v5529_v60 = vadd.f32 %v301_v41, %v140_v33 }
 0x130   :  { %v303_v10 = vpop.f32.mrf.mxu1  ;;  %v679_v12 = vpop.f32.mrf.mxu0 }
 0x131   :  { %6137 = vst [vmem:[#allocation35_spill] sm:$0xff] %v5529_v60  ;;  %v5531_v14 = vadd.f32 %v303_v10, %v144_v36 }
 0x132   :  { %v305_v23 = vpop.f32.mrf.mxu1  ;;  %v681_v22 = vpop.f32.mrf.mxu0 }
 0x133   :  { %6138 = vst [vmem:[#allocation36_spill] sm:$0xff] %v5531_v14 }
 0x134   :  { %v306_v4 = vpop.f32.mrf.mxu1  ;;  %v682_v0 = vpop.f32.mrf.mxu0 }
 0x136   :  { %v342_v40 = vpop.f32.mrf.mxu1 }
 0x137   :  { %v343_v55 = vadd.f32 %v342_v40, %v148_v24 }
 0x138   :  { %v344_v35 = vpop.f32.mrf.mxu1 }
 0x139   :  { %v345_v39 = vadd.f32 %v344_v35, %v152_v30 }
 0x13a   :  { %v346_v43 = vpop.f32.mrf.mxu1 }
 0x13b   :  { %v5533_v38 = vadd.f32 %v346_v43, %v148_v24 }
 0x13c   :  { %v348_v33 = vpop.f32.mrf.mxu1 }
 0x13d   :  { %6139 = vst [vmem:[#allocation37_spill] sm:$0xff] %v5533_v38  ;;  %v5535_v41 = vadd.f32 %v348_v33, %v152_v30 }
 0x13e   :  { %v352_v60 = vpop.f32.mrf.mxu1 }
 0x13f   :  { %6140 = vst [vmem:[#allocation38_spill] sm:$0xff] %v5535_v41  ;;  %v5537_v36 = vadd.f32 %v352_v60, %v148_v24 }
 0x140   :  { %v354_v16 = vpop.f32.mrf.mxu1 }
 0x141   :  { %6141 = vst [vmem:[#allocation39_spill] sm:$0xff] %v5537_v36  ;;  %v5539_v10 = vadd.f32 %v354_v16, %v152_v30 }
 0x142   :  { %v356_v22 = vpop.f32.mrf.mxu1 }
 0x143   :  { %6142 = vst [vmem:[#allocation40_spill] sm:$0xff] %v5539_v10  ;;  %v5541_v4 = vadd.f32 %v356_v22, %v148_v24 }
 0x144   :  { %v358_v0 = vpop.f32.mrf.mxu1 }
 0x145   :  { %6143 = vst [vmem:[#allocation41_spill] sm:$0xff] %v5541_v4  ;;  %v5543_v26 = vadd.f32 %v358_v0, %v152_v30 }
 0x146   :  { %v362_v23 = vpop.f32.mrf.mxu1 }
 0x147   :  { %6144 = vst [vmem:[#allocation42_spill] sm:$0xff] %v5543_v26  ;;  %v5545_v40 = vadd.f32 %v362_v23, %v148_v24 }
 0x148   :  { %v364_v43 = vpop.f32.mrf.mxu1 }
 0x149   :  { %6145 = vst [vmem:[#allocation43_spill] sm:$0xff] %v5545_v40  ;;  %v5547_v8 = vadd.f32 %v364_v43, %v152_v30 }
 0x14a   :  { %v366_v20 = vpop.f32.mrf.mxu1 }
 0x14b   :  { %6146 = vst [vmem:[#allocation44_spill] sm:$0xff] %v5547_v8 }
 0x14c   :  { %v367_v35 = vpop.f32.mrf.mxu1 }
 0x14e   :  { %v919_v33 = vpop.f32.mrf.mxu0 }
 0x14f   :  { %v920_v22 = vadd.f32 %v919_v33, %v677_v2 }
 0x150   :  { %v921_v60 = vpop.f32.mrf.mxu0 }
 0x151   :  { %v922_v38 = vadd.f32 %v921_v60, %v679_v12  ;;  %v967_v26 = vadd.f32 %v920_v22, %v5514_v11 }
 0x152   :  { %v923_v14 = vpop.f32.mrf.mxu0 }
 0x153   :  { %v968_v0 = vadd.f32 %v922_v38, %v284_v6  ;;  %v4083_v23 = vmul.f32 -1.442695, %v967_v26 }
 0x154   :  { %v924_v36 = vpop.f32.mrf.mxu0 }
 0x155   :  { %v4084_v24 = vmul.f32 -1.442695, %v968_v0 }
 0x156   :  { %v718_v16 = vpop.f32.mrf.mxu1 }
 0x157   :  { %4928 = vpow2.f32 %v4084_v24 }
 0x158   :  { %v720_v10 = vpop.f32.mrf.mxu1  ;;  %4930 = vpow2.f32 %v4083_v23  ;;  %v5008_v23 = vld [vmem:[#allocation9 + $0xe0] ss:$16 sps:$4 sm:$0xff]  }
 0x15a   :  { %v722_v4 = vpop.f32.mrf.mxu1 }
 0x15c   :  { %v723_v41 = vpop.f32.mrf.mxu1 }
 0x164   :  { %v4929_v30 = vpop.eup %4928 }
 0x165   :  { %v4931_v43 = vpop.eup %4930  ;;  %v980_v20 = vadd.f32 1.0, %v4929_v30 }
 0x166   :  { %v974_v35 = vadd.f32 1.0, %v4931_v43 }
 0x167   :  { %4932 = vrcp.f32 %v980_v20 }
 0x168   :  { %4934 = vrcp.f32 %v974_v35 }
 0x174   :  { %v4933_v41 = vpop.eup %4932 }
 0x175   :  { %v4935_v4 = vpop.eup %4934  ;;  %v990_v33 = vmul.f32 0.0, %v4933_v41  ;;  %v5649_v41 = vld [vmem:[#allocation11 + $0xc0] ss:$16 sps:$4 sm:$0xff]  }
 0x176   :  { %v960_v40 = vpop.f32.mrf.mxu1 }
 0x177   :  { %v961_v14 = vadd.f32 %v960_v40, %v718_v16 }
 0x178   :  { %v962_v36 = vpop.f32.mrf.mxu1 }
 0x179   :  { %v969_v8 = vadd.f32 %v961_v14, %v343_v55  ;;  %v963_v12 = vadd.f32 %v962_v36, %v720_v10  ;;  %v6162_v36 = vmov 1.0|1.0  }
 0x17a   :  { %v964_v2 = vpop.f32.mrf.mxu1 }
 0x17b   :  { %4936 = vtanh.f32 %v969_v8  ;;  %v970_v38 = vadd.f32 %v963_v12, %v345_v39  ;;  %v5556_v39 = vld [vmem:[%s6077_s7] ss:$0 sm:$0xff]  ;;  %v4704_v12 = vld [vmem:[#allocation12 + $0x38] sm:$0xff]  }
 0x17c   :  { %v965_v6 = vpop.f32.mrf.mxu1  ;;  %v5640_v2 = vld [vmem:[#allocation11 + $0xe4] ss:$16 sps:$4 sm:$0xff]  }
 0x17d   :  { %v4085_v11 = vmul.f32 -1.442695, %v970_v38  ;;  %v5642_v38 = vld [vmem:[#allocation11 + $0xe0] ss:$16 sps:$4 sm:$0xff]  }
 0x17e   :  { %v4708_v6 = vld [vmem:[#allocation12 + $0x30] sm:$0xff]  }
 0x17f   :  { %4938 = vpow2.f32 %v4085_v11  ;;  %v5647_v11 = vld [vmem:[#allocation11 + $0xc4] ss:$16 sps:$4 sm:$0xff]  }
 0x188   :  { %v4937_v26 = vpop.eup %4936 }
 0x189   :  { %v991_v60 = vmul.f32 %v4937_v26, %v4935_v4  ;;  %v4712_v4 = vld [vmem:[#allocation12 + $0x28] sm:$0xff]   ;;  %v5654_v26 = vld [vmem:[#allocation11 + $0xa4] ss:$16 sps:$4 sm:$0xff]  }
 0x18b   :  { %v5550_v22 = vadd.f32 %v991_v60, %v990_v33  ;;  %v5656_v33 = vld [vmem:[#allocation11 + $0xa0] ss:$16 sps:$4 sm:$0xff]  }
 0x18c   :  { %v4939_v0 = vpop.eup %4938  ;;  %v4716_v60 = vld [vmem:[#allocation12 + $0x20] sm:$0xff]  }
 0x18d   :  { %v987_v40 = vadd.f32 1.0, %v4939_v0  ;;  %4940 = vtanh.f32 %v5550_v22  ;;  %v5661_v0 = vld [vmem:[#allocation11 + $0x80] ss:$16 sps:$4 sm:$0xff]  }
 0x18f   :  { %4942 = vrcp.f32 %v987_v40  ;;  %v5663_v40 = vld [vmem:[#allocation11 + $0x84] ss:$16 sps:$4 sm:$0xff]  }
 0x19a   :  { %v4941_v55 = vpop.eup %4940 }
 0x19c   :  { %v4943_v10 = vpop.eup %4942 }
 0x19d   :  { %v994_v8 = vmul.f32 %v4943_v10, %v4941_v55  ;;  %v5665_v55 = vld [vmem:[#allocation11 + $0x64] ss:$16 sps:$4 sm:$0xff]   ;;  %v4720_v10 = vld [vmem:[#allocation12 + $0x18] sm:$0xff]  }
 0x19f   :  { %v995_v16 = vmul.f32 %v5556_v39, %v994_v8  ;;  %v5670_v8 = vld [vmem:[#allocation11 + $0x60] ss:$16 sps:$4 sm:$0xff]  }
 0x1a1   :  { %v996_v24 = vpack.c.bf16 %v995_v16, %v995_v16  ;;  %v5673_v16 = vld [vmem:[#allocation11 + $0x44] ss:$16 sps:$4 sm:$0xff]  }
 0x1a3   :  { %4476 = vmatmul.mubr.bf16.vlgmr.msra.gmra.mxu0 %v996_v24  ;;  %1391 = vmatmul.mubr.bf16.vlgmr.msra.gmra.mxu1 %v996_v24 }
 0x1a4   :  { %1400 = vmatpush1.bf16.msra.mxu0 %v5330_v47  ;;  %1431 = vmatprep.mubr.bf16.mxu0 %v6129_v42  ;;  %v6150_v47 = vld [vmem:[#allocation23_spill] sm:$0xff] }
 0x1a5   :  { %1401 = vmatprep.subr.bf16.mxu0 %v5336_v49  ;;  %1601 = vmatpush1.bf16.msra.mxu1 %v5008_v23  ;;  %v6152_v49 = vld [vmem:[#allocation25_spill] sm:$0xff] }
 0x1a6   :  { %1602 = vmatprep.subr.bf16.mxu1 %v5317_v44  ;;  %1632 = vmatprep.mubr.bf16.mxu1 %v6129_v42  ;;  %v6147_v44 = vmov 0.0   ;;  %v5677_v23 = vld [vmem:[#allocation11 + $0x40] ss:$16 sps:$4 sm:$0xff]  }
 0x1a8   :  { %1402 = vmatpush1.bf16.msra.mxu0 %v5342_v51  ;;  %v6154_v51 = vld [vmem:[#allocation27_spill] sm:$0xff] }
 0x1a9   :  { %1403 = vmatprep.subr.bf16.mxu0 %v5350_v53  ;;  %1603 = vmatpush1.bf16.msra.mxu1 %v5323_v45  ;;  %v6148_v45 = vld [vmem:[#allocation21_spill] sm:$0xff] }
 0x1aa   :  { %1604 = vmatprep.subr.bf16.mxu1 %v5327_v46  ;;  %v6149_v46 = vld [vmem:[#allocation22_spill] sm:$0xff]  ;;  %v5611_v53 = vld [vmem:[%s6076_s6] ss:$0 sm:$0xff] }
 0x1ab   :  { %6156 = vst [vmem:[#allocation21_spill] sm:$0xff] %v5611_v53 }
 0x1ac   :  { %1404 = vmatpush1.bf16.msra.mxu0 %v5355_v56 }
 0x1ad   :  { %1405 = vmatprep.subr.bf16.mxu0 %v5363_v58  ;;  %1605 = vmatpush1.bf16.msra.mxu1 %v5333_v48  ;;  %v6151_v48 = vld [vmem:[#allocation24_spill] sm:$0xff] }
 0x1ae   :  { %1606 = vmatprep.subr.bf16.mxu1 %v5338_v50  ;;  %v6153_v50 = vld [vmem:[#allocation26_spill] sm:$0xff] }
 0x1b0   :  { %1406 = vmatpush1.bf16.msra.mxu0 %v5371_v61 }
 0x1b1   :  { %1407 = vmatprep.subr.bf16.mxu0 %v5379_v63  ;;  %1607 = vmatpush1.bf16.msra.mxu1 %v5346_v52  ;;  %v6155_v52 = vld [vmem:[#allocation28_spill] sm:$0xff] }
 0x1b2   :  { %1608 = vmatprep.subr.bf16.mxu1 %v5352_v54 }
 0x1b4   :  { %1408 = vmatpush1.bf16.msra.mxu0 %v5384_v3 }
 0x1b5   :  { %1409 = vmatprep.subr.bf16.mxu0 %v5389_v7  ;;  %1609 = vmatpush1.bf16.msra.mxu1 %v5359_v57 }
 0x1b6   :  { %1610 = vmatprep.subr.bf16.mxu1 %v5365_v59 }
 0x1b8   :  { %1410 = vmatpush1.bf16.msra.mxu0 %v5404_v13 }
 0x1b9   :  { %1411 = vmatprep.subr.bf16.mxu0 %v5410_v17  ;;  %1611 = vmatpush1.bf16.msra.mxu1 %v5375_v62  ;;  %v6157_v62 = vld [vmem:[#allocation20_spill] sm:$0xff] }
 0x1ba   :  { %1612 = vmatprep.subr.bf16.mxu1 %v5381_v1  ;;  %vm406_vm5 = vcmp.ge.s32.totalorder %v6157_v62, 32  ;;  %v5620_v3 = vsub.s32 127, %v6157_v62  ;;  %v6163_v62 = vld [vmem:[#allocation29_spill] sm:$0xff] }
 0x1bb   :  { %vm5624_vm6 = vmor %vm405_vm1, %vm406_vm5 }
 0x1bc   :  { %1412 = vmatpush1.bf16.msra.mxu0 %v5416_v18  ;;  %6158 = vst [vmem:[#allocation22_spill] sm:$0xff] %v5620_v3 }
 0x1bd   :  { %1413 = vmatprep.subr.bf16.mxu0 %v5419_v19  ;;  %1613 = vmatpush1.bf16.msra.mxu1 %v5386_v5 }
 0x1be   :  { %1614 = vmatprep.subr.bf16.mxu1 %v5391_v9 }
 0x1c0   :  { %1414 = vmatpush1.bf16.msra.mxu0 %v5424_v21 }
 0x1c1   :  { %1641 = vmatprep.subr.bf16.mxu0 %v5429_v25  ;;  %1615 = vmatpush1.bf16.msra.mxu1 %v5406_v15  ;;  %v6159_v15 = vmov 0 }
 0x1c2   :  { %4479 = vmatprep.subr.bf16.mxu1 %v6147_v44  ;;  %v6160_v15 = vsel %vm5624_vm6, 4294967295, %v6159_v15 }
 0x1c3   :  { %1432 = vmatmul.mubr.bf16.vlgmr.msra.gmra.mxu0 %v996_v24  ;;  %6161 = vst [vmem:[#allocation23_spill] sm:$0xff] %v6160_v15  ;;  %v4724_v24 = vld [vmem:[#allocation12 + $0x10] sm:$0xff]  }
 0x1c4   :  { %1642 = vmatpush1.bf16.msra.mxu0 %v5433_v27  ;;  %1673 = vmatprep.mubr.bf16.mxu0 %v6129_v42  ;;  %v5822_v15 = vld [vmem:[#allocation9 + $0x64] ss:$16 sps:$4 sm:$0xff]  }
 0x1c5   :  { %1643 = vmatprep.subr.bf16.mxu0 %v5435_v28 }
 0x1c8   :  { %1644 = vmatpush1.bf16.msra.mxu0 %v5439_v29 }
 0x1c9   :  { %1645 = vmatprep.subr.bf16.mxu0 %v5442_v31 }
 0x1cc   :  { %1646 = vmatpush1.bf16.msra.mxu0 %v5447_v32 }
 0x1cd   :  { %1647 = vmatprep.subr.bf16.mxu0 %v5449_v34 }
 0x1d0   :  { %1648 = vmatpush1.bf16.msra.mxu0 %v5453_v37 }
 0x1d1   :  { %1649 = vmatprep.subr.bf16.mxu0 %v6148_v45  ;;  %v5680_v45 = vld [vmem:[#allocation11 + $0x24] ss:$16 sps:$4 sm:$0xff]  }
 0x1d4   :  { %1650 = vmatpush1.bf16.msra.mxu0 %v6149_v46  ;;  %v4728_v46 = vld [vmem:[#allocation12 + $0x8] sm:$0xff]  }
 0x1d5   :  { %1651 = vmatprep.subr.bf16.mxu0 %v6150_v47  ;;  %v5684_v47 = vld [vmem:[#allocation11 + $0x20] ss:$16 sps:$4 sm:$0xff]  }
 0x1d8   :  { %1652 = vmatpush1.bf16.msra.mxu0 %v6151_v48  ;;  %v5687_v48 = vld [vmem:[#allocation11 + $0x4] ss:$16 sps:$4 sm:$0xff]  }
 0x1d9   :  { %1653 = vmatprep.subr.bf16.mxu0 %v6152_v49  ;;  %v4732_v49 = vld [vmem:[#allocation12] sm:$0xff]  }
 0x1dc   :  { %1654 = vmatpush1.bf16.msra.mxu0 %v6153_v50  ;;  %v5691_v50 = vld [vmem:[#allocation11] ss:$16 sps:$4 sm:$0xff]  }
 0x1dd   :  { %1655 = vmatprep.subr.bf16.mxu0 %v6154_v51  ;;  %v5693_v51 = vld [vmem:[#allocation11 + $0xec] ss:$16 sps:$4 sm:$0xff]  }
 0x1e0   :  { %1656 = vmatpush1.bf16.msra.mxu0 %v6155_v52 }
 0x1e1   :  { %2074 = vmatprep.subr.bf16.mxu0 %v5640_v2 }
 0x263   :  { %v1095_v54 = vpop.f32.mrf.mxu0  ;;  %v5613_v56 = vpop.f32.mrf.mxu1 }
 0x264   :  { %v1096_v57 = vadd.f32 %v5611_v53, %v1095_v54 }
 0x265   :  { %v4477_v58 = vpop.f32.mrf.mxu0  ;;  %v5616_v59 = vpop.f32.mrf.mxu1 }
 0x266   :  { %1101 = vst [vmem:[#allocation14] sm:$0xff] %v1096_v57  ;;  %vm1103_vm4 = vcmp.lt.s32.totalorder %v1096_v57, 0  ;;  %v1104_v61 = vxor.u32 2147483647, %v1096_v57 }
 0x267   :  { %v1098_v63 = vpop.f32.mrf.mxu0  ;;  %v1396_v1 = vpop.f32.mrf.mxu1 }
 0x268   :  { %v1105_v5 = vsel %vm1103_vm4, %v1104_v61, %v1096_v57 }
 0x269   :  { %v4478_v7 = vpop.f32.mrf.mxu0  ;;  %v1397_v9 = vpop.f32.mrf.mxu1  ;;  %v1106_v13 = vand.u32 4294967168, %v1105_v5 }
 0x26b   :  { %v1107_v17 = vor.u32 %v1106_v13, %v5620_v3  ;;  %v6164_v13 = vld [vmem:[#allocation30_spill] sm:$0xff] }
 0x26d   :  { %v1108_v18 = vsel %vm5624_vm6, 2147483648, %v1107_v17 }
 0x26e   :  { %v1110_v19 = vshra.s32 %v1108_v18, 16  ;;  %v1109_v31 = vand.u32 65535, %v1108_v18 }
 0x270   :  { %v1112_v21 = vcvt.s32.f32 %v1110_v19  ;;  %v1111_v34 = vcvt.s32.f32 %v1109_v31 }
 0x272   :  { %1113 = vmax.xlane.f32.xlu0 %v1112_v21 }
 0x283   :  { %v5631_v25 = vpop.f32.mrf.mxu0 }
 0x285   :  { %v5633_v27 = vpop.f32.mrf.mxu0 }
 0x287   :  { %v1437_v28 = vpop.f32.mrf.mxu0 }
 0x289   :  { %v1438_v29 = vpop.f32.mrf.mxu0 }
 0x28a   :  { %v6165_v29 = vld [vmem:[#allocation38_spill] sm:$0xff] }
 0x2fb   :  { %v1114_v32 = vpop.xlane.xlu0 %1113 }
 0x2fc   :  { %vm1115_vm7 = vcmp.eq.f32.partialorder %v1112_v21, %v1114_v32  ;;  %v1120_v30 = vcvt.f32.s32 %v1114_v32  ;;  %v6166_v32 = vld [vmem:[#allocation37_spill] sm:$0xff] }
 0x2fd   :  { %v1116_v37 = vsel %vm1115_vm7, %v1111_v34, -inf }
 0x2fe   :  { %1117 = vmax.xlane.f32.xlu0 %v1116_v37  ;;  %v1121_v20 = vshll.u32 %v1120_v30, 16 }
 0x387   :  { %v1118_v43 = vpop.xlane.xlu0 %1117 }
 0x388   :  { %v1119_v35 = vcvt.f32.s32 %v1118_v43 }
 0x38a   :  { %v1122_v14 = vadd.s32 %v1121_v20, %v1119_v35 }
 0x38c   :  { %vm1123_vm8 = vcmp.eq.s32.totalorder %v1108_v18, %v1122_v14 }
 0x38d   :  { %vm4159_vm9 = vmpackc.low %vm1123_vm8, %vm1123_vm8 }
 0x38e   :  { %4160 = vmatmul.mubr.msk.bf16.vlgmr.msra.gmra.mxu1 %vm4159_vm9, %v6162_v36  ;;  %4162 = vmatmul.mubr.msk.bf16.vlgmr.msra.gmra.mxu0 %vm4159_vm9, %v6162_v36 }
 0x38f   :  { %4495 = vmatprep.mubr.msk.bf16.mxu1 %vm5176_vm3, %v6147_v44  ;;  %2106 = vmatprep.mubr.bf16.mxu0 %v6129_v42 }
 0x390   :  { %4480 = vmatpush3.bf16.msra.mxu1 %v4704_v12  ;;  %2075 = vmatpush1.bf16.msra.mxu0 %v5642_v38 }
 0x391   :  { %4481 = vmatprep.subr.bf16.mxu1 %v6147_v44  ;;  %2076 = vmatprep.subr.bf16.mxu0 %v5647_v11 }
 0x394   :  { %4482 = vmatpush3.bf16.msra.mxu1 %v4708_v6  ;;  %2077 = vmatpush1.bf16.msra.mxu0 %v5649_v41 }
 0x395   :  { %4483 = vmatprep.subr.bf16.mxu1 %v6147_v44  ;;  %2078 = vmatprep.subr.bf16.mxu0 %v5654_v26 }
 0x398   :  { %4484 = vmatpush3.bf16.msra.mxu1 %v4712_v4  ;;  %2079 = vmatpush1.bf16.msra.mxu0 %v5656_v33 }
 0x399   :  { %4485 = vmatprep.subr.bf16.mxu1 %v6147_v44  ;;  %2080 = vmatprep.subr.bf16.mxu0 %v5663_v40 }
 0x39c   :  { %4486 = vmatpush3.bf16.msra.mxu1 %v4716_v60  ;;  %2081 = vmatpush1.bf16.msra.mxu0 %v5661_v0 }
 0x39d   :  { %4487 = vmatprep.subr.bf16.mxu1 %v6147_v44  ;;  %2082 = vmatprep.subr.bf16.mxu0 %v5665_v55 }
 0x3a0   :  { %4488 = vmatpush3.bf16.msra.mxu1 %v4720_v10  ;;  %2083 = vmatpush1.bf16.msra.mxu0 %v5670_v8 }
 0x3a1   :  { %4489 = vmatprep.subr.bf16.mxu1 %v6147_v44  ;;  %2084 = vmatprep.subr.bf16.mxu0 %v5673_v16 }
 0x3a4   :  { %4490 = vmatpush3.bf16.msra.mxu1 %v4724_v24  ;;  %2085 = vmatpush1.bf16.msra.mxu0 %v5677_v23 }
 0x3a5   :  { %4491 = vmatprep.subr.bf16.mxu1 %v6147_v44  ;;  %2086 = vmatprep.subr.bf16.mxu0 %v5680_v45 }
 0x3a8   :  { %4492 = vmatpush3.bf16.msra.mxu1 %v4728_v46  ;;  %2087 = vmatpush1.bf16.msra.mxu0 %v5684_v47 }
 0x3a9   :  { %4493 = vmatprep.subr.bf16.mxu1 %v6147_v44  ;;  %2088 = vmatprep.subr.bf16.mxu0 %v5687_v48 }
 0x3ac   :  { %4494 = vmatpush3.bf16.msra.mxu1 %v4732_v49  ;;  %2089 = vmatpush1.bf16.msra.mxu0 %v5691_v50 }
 0x3ad   :  { %2115 = vmatprep.subr.bf16.mxu1 %v5693_v51 }
 0x44e   :  { %v1634_v52 = vpop.f32.mrf.mxu1  ;;  %v1675_v54 = vpop.f32.mrf.mxu0 }
 0x44f   :  { %v1635_v57 = vadd.f32 %v1634_v52, %v5613_v56  ;;  %v1676_v56 = vadd.f32 %v1675_v54, %v5631_v25  ;;  %v5711_v52 = vld [vmem:[#allocation11 + $0xe8] ss:$16 sps:$4 sm:$0xff]  }
 0x450   :  { %v1636_v58 = vpop.f32.mrf.mxu1  ;;  %v1677_v61 = vpop.f32.mrf.mxu0 }
 0x451   :  { %v1682_v63 = vadd.f32 %v1635_v57, %v6163_v62  ;;  %v1637_v1 = vadd.f32 %v1636_v58, %v5616_v59  ;;  %v1678_v28 = vadd.f32 %v1677_v61, %v5633_v27  ;;  %v1684_v34 = vadd.f32 %v1676_v56, %v6166_v32  ;;  %v5713_v57 = vld [vmem:[#allocation11 + $0xcc] ss:$16 sps:$4 sm:$0xff]   ;;  %v5724_v61 = vld [vmem:[#allocation11 + $0xa8] ss:$16 sps:$4 sm:$0xff]  }
 0x452   :  { %v1638_v5 = vpop.f32.mrf.mxu1  ;;  %v1679_v7 = vpop.f32.mrf.mxu0  ;;  %v5720_v58 = vld [vmem:[#allocation11 + $0xac] ss:$16 sps:$4 sm:$0xff]  }
 0x453   :  { %v4163_v9 = vmul.f32 -1.442695, %v1682_v63  ;;  %v1683_v17 = vadd.f32 %v1637_v1, %v6164_v13  ;;  %v1685_v31 = vadd.f32 %v1678_v28, %v6165_v29  ;;  %v5727_v62 = vld [vmem:[#allocation11 + $0x8c] ss:$16 sps:$4 sm:$0xff]   ;;  %v5730_v63 = vld [vmem:[#allocation11 + $0x88] ss:$16 sps:$4 sm:$0xff]  }
 0x454   :  { %v1639_v18 = vpop.f32.mrf.mxu1  ;;  %v1680_v19 = vpop.f32.mrf.mxu0  ;;  %v5733_v1 = vld [vmem:[#allocation11 + $0x6c] ss:$16 sps:$4 sm:$0xff]   ;;  %v5736_v5 = vld [vmem:[#allocation11 + $0x68] ss:$16 sps:$4 sm:$0xff]  }
 0x455   :  { %4944 = vpow2.f32 %v4163_v9  ;;  %v4164_v21 = vmul.f32 -1.442695, %v1683_v17  ;;  %v4165_v37 = vmul.f32 -1.442695, %v1685_v31  ;;  %v5739_v7 = vld [vmem:[#allocation11 + $0x4c] ss:$16 sps:$4 sm:$0xff]  }
 0x456   :  { %v5742_v9 = vld [vmem:[#allocation11 + $0x48] ss:$16 sps:$4 sm:$0xff]   ;;  %v5745_v13 = vld [vmem:[#allocation11 + $0x2c] ss:$16 sps:$4 sm:$0xff]  }
 0x457   :  { %4946 = vpow2.f32 %v4164_v21  ;;  %v5748_v17 = vld [vmem:[#allocation11 + $0x28] ss:$16 sps:$4 sm:$0xff]   ;;  %v5751_v18 = vld [vmem:[#allocation11 + $0xc] ss:$16 sps:$4 sm:$0xff]  }
 0x458   :  { %4948 = vtanh.f32 %v1684_v34  ;;  %6167 = vst [vmem:[#allocation24_spill] sm:$0xff] %v5748_v17  ;;  %6168 = vst [vmem:[#allocation25_spill] sm:$0xff] %v5751_v18  ;;  %v5754_v19 = vld [vmem:[#allocation11 + $0x8] ss:$16 sps:$4 sm:$0xff]  }
 0x459   :  { %4950 = vpow2.f32 %v4165_v37  ;;  %6169 = vst [vmem:[#allocation26_spill] sm:$0xff] %v5754_v19 }
 0x462   :  { %v4945_v59 = vpop.eup %4944 }
 0x463   :  { %v1689_v30 = vadd.f32 1.0, %v4945_v59 }
 0x464   :  { %v4947_v43 = vpop.eup %4946 }
 0x465   :  { %4952 = vrcp.f32 %v1689_v30  ;;  %v1695_v20 = vadd.f32 1.0, %v4947_v43  ;;  %v4949_v35 = vpop.eup %4948 }
 0x466   :  { %v4951_v14 = vpop.eup %4950 }
 0x467   :  { %4954 = vrcp.f32 %v1695_v20  ;;  %v1702_v4 = vadd.f32 1.0, %v4951_v14 }
 0x469   :  { %4956 = vrcp.f32 %v1702_v4  ;;  %v5775_v4 = vld [vmem:[#allocation9 + $0xe4] ss:$16 sps:$4 sm:$0xff]  }
 0x46a   :  { %2316 = vmatprep.subr.bf16.mxu0 %v5775_v4 }
 0x472   :  { %v4953_v12 = vpop.eup %4952 }
 0x473   :  { %v1706_v6 = vmul.f32 %v4953_v12, %v4949_v35 }
 0x474   :  { %v4955_v27 = vpop.eup %4954 }
 0x475   :  { %v1705_v25 = vmul.f32 %v4955_v27, %v5550_v22  ;;  %v5716_v22 = vld [vmem:[#allocation11 + $0xc8] ss:$16 sps:$4 sm:$0xff]   ;;  %v5773_v27 = vld [vmem:[#allocation9 + $0xe0] ss:$16 sps:$4 sm:$0xff]  }
 0x476   :  { %v4957_v10 = vpop.eup %4956 }
 0x477   :  { %v5707_v60 = vadd.f32 %v1706_v6, %v1705_v25  ;;  %v5777_v25 = vld [vmem:[#allocation9 + $0xe8] ss:$16 sps:$4 sm:$0xff]  }
 0x478   :  { %6170 = vst [vmem:[#allocation27_spill] sm:$0xff] %v5777_v25 }
 0x479   :  { %4958 = vtanh.f32 %v5707_v60 }
 0x486   :  { %v4959_v24 = vpop.eup %4958 }
 0x487   :  { %v1709_v46 = vmul.f32 %v4959_v24, %v4957_v10  ;;  %v5779_v10 = vld [vmem:[#allocation9 + $0xec] ss:$16 sps:$4 sm:$0xff]   ;;  %v5781_v24 = vld [vmem:[#allocation9 + $0xc4] ss:$16 sps:$4 sm:$0xff]  }
 0x488   :  { %6171 = vst [vmem:[#allocation28_spill] sm:$0xff] %v5779_v10 }
 0x489   :  { %v1710_v49 = vmul.f32 %v5556_v39, %v1709_v46  ;;  %v5784_v46 = vld [vmem:[#allocation9 + $0xcc] ss:$16 sps:$4 sm:$0xff]  }
 0x48a   :  { %6172 = vst [vmem:[#allocation20_spill] sm:$0xff] %v5784_v46 }
 0x48b   :  { %v1711_v54 = vpack.c.bf16 %v1710_v49, %v1710_v49  ;;  %v5788_v49 = vld [vmem:[#allocation9 + $0xc0] ss:$16 sps:$4 sm:$0xff]  }
 0x48d   :  { %4496 = vmatmul.mubr.bf16.vlgmr.msra.gmra.mxu1 %v1711_v54  ;;  %2107 = vmatmul.mubr.bf16.vlgmr.msra.gmra.mxu0 %v1711_v54 }
 0x48e   :  { %2116 = vmatpush1.bf16.msra.mxu1 %v5711_v52  ;;  %2147 = vmatprep.mubr.bf16.mxu1 %v6129_v42 }
 0x48f   :  { %2117 = vmatprep.subr.bf16.mxu1 %v5713_v57  ;;  %2348 = vmatprep.mubr.bf16.mxu0 %v6129_v42 }
 0x490   :  { %2317 = vmatpush1.bf16.msra.mxu0 %v5773_v27 }
 0x491   :  { %2318 = vmatprep.subr.bf16.mxu0 %v5781_v24 }
 0x492   :  { %2118 = vmatpush1.bf16.msra.mxu1 %v5716_v22 }
 0x493   :  { %2119 = vmatprep.subr.bf16.mxu1 %v5720_v58 }
 0x494   :  { %2319 = vmatpush1.bf16.msra.mxu0 %v5788_v49 }
 0x496   :  { %2120 = vmatpush1.bf16.msra.mxu1 %v5724_v61 }
 0x497   :  { %2121 = vmatprep.subr.bf16.mxu1 %v5727_v62 }
 0x49a   :  { %2122 = vmatpush1.bf16.msra.mxu1 %v5730_v63 }
 0x49b   :  { %2123 = vmatprep.subr.bf16.mxu1 %v5733_v1 }
 0x49e   :  { %2124 = vmatpush1.bf16.msra.mxu1 %v5736_v5 }
 0x49f   :  { %2125 = vmatprep.subr.bf16.mxu1 %v5739_v7 }
 0x4a2   :  { %2126 = vmatpush1.bf16.msra.mxu1 %v5742_v9 }
 0x4a3   :  { %2127 = vmatprep.subr.bf16.mxu1 %v5745_v13 }
 0x4a6   :  { %2128 = vmatpush1.bf16.msra.mxu1 %v5748_v17  ;;  %v5869_v17 = vld [vmem:[#allocation9 + $0x8] ss:$16 sps:$4 sm:$0xff]  }
 0x4a7   :  { %2129 = vmatprep.subr.bf16.mxu1 %v5751_v18  ;;  %v5867_v18 = vld [vmem:[#allocation9] ss:$16 sps:$4 sm:$0xff]  }
 0x4aa   :  { %2130 = vmatpush1.bf16.msra.mxu1 %v5754_v19  ;;  %v5863_v19 = vld [vmem:[#allocation9 + $0x4] ss:$16 sps:$4 sm:$0xff]  }
 0x4ab   :  { %2357 = vmatprep.subr.bf16.mxu1 %v5779_v10 }
 0x4ad   :  { %2148 = vmatmul.mubr.bf16.vlgmr.msra.gmra.mxu1 %v1711_v54  ;;  %v5792_v54 = vld [vmem:[#allocation9 + $0xc8] ss:$16 sps:$4 sm:$0xff]  }
 0x4ae   :  { %2389 = vmatprep.mubr.bf16.mxu1 %v6129_v42  ;;  %2358 = vmatpush1.bf16.msra.mxu1 %v5777_v25  ;;  %6173 = vst [vmem:[#allocation29_spill] sm:$0xff] %v5792_v54 }
 0x4af   :  { %2359 = vmatprep.subr.bf16.mxu1 %v5784_v46  ;;  %v5856_v46 = vld [vmem:[#allocation9 + $0x28] ss:$16 sps:$4 sm:$0xff]  }
 0x4b0   :  { %6182 = vst [vmem:[#allocation50_spill] sm:$0xff] %v5856_v46 }
 0x4b2   :  { %2360 = vmatpush1.bf16.msra.mxu1 %v5792_v54  ;;  %v5849_v54 = vld [vmem:[#allocation9 + $0x2c] ss:$16 sps:$4 sm:$0xff]  }
 0x54d   :  { %v1810_v21 = vpop.f32.mrf.mxu1  ;;  %v5759_v28 = vpop.f32.mrf.mxu0 }
 0x54e   :  { %v1811_v56 = vadd.f32 %v5611_v53, %v1810_v21  ;;  %v5794_v21 = vld [vmem:[#allocation9 + $0xa4] ss:$16 sps:$4 sm:$0xff]  }
 0x54f   :  { %v4497_v29 = vpop.f32.mrf.mxu1  ;;  %v5762_v31 = vpop.f32.mrf.mxu0  ;;  %2320 = vmatprep.subr.bf16.mxu0 %v5794_v21  ;;  %v5834_v53 = vld [vmem:[#allocation9 + $0x44] ss:$16 sps:$4 sm:$0xff]  }
 0x550   :  { %1817 = vst [vmem:[#allocation14 + $0x8] sm:$0xff] %v1811_v56  ;;  %vm1819_vm10 = vcmp.lt.s32.totalorder %v1811_v56, 0  ;;  %v1820_v32 = vxor.u32 2147483647, %v1811_v56  ;;  %v5799_v29 = vld [vmem:[#allocation9 + $0xac] ss:$16 sps:$4 sm:$0xff]  }
 0x551   :  { %v1813_v34 = vpop.f32.mrf.mxu1  ;;  %v2112_v37 = vpop.f32.mrf.mxu0  ;;  %6174 = vst [vmem:[#allocation30_spill] sm:$0xff] %v5799_v29  ;;  %2361 = vmatprep.subr.bf16.mxu1 %v5799_v29  ;;  %v5844_v29 = vld [vmem:[#allocation9 + $0x48] ss:$16 sps:$4 sm:$0xff]  }
 0x552   :  { %v1821_v59 = vsel %vm1819_vm10, %v1820_v32, %v1811_v56  ;;  %v5804_v34 = vld [vmem:[#allocation9 + $0xa0] ss:$16 sps:$4 sm:$0xff]   ;;  %v5808_v37 = vld [vmem:[#allocation9 + $0xa8] ss:$16 sps:$4 sm:$0xff]   ;;  %6181 = vst [vmem:[#allocation49_spill] sm:$0xff] %v5844_v29 }
 0x553   :  { %v4498_v30 = vpop.f32.mrf.mxu1  ;;  %v2113_v43 = vpop.f32.mrf.mxu0  ;;  %v1822_v20 = vand.u32 4294967168, %v1821_v59  ;;  %6175 = vst [vmem:[#allocation38_spill] sm:$0xff] %v5808_v37  ;;  %v5810_v59 = vld [vmem:[#allocation9 + $0x84] ss:$16 sps:$4 sm:$0xff]   ;;  %2321 = vmatpush1.bf16.msra.mxu0 %v5804_v34  ;;  %2362 = vmatpush1.bf16.msra.mxu1 %v5808_v37  ;;  %v5837_v37 = vld [vmem:[#allocation9 + $0x4c] ss:$16 sps:$4 sm:$0xff]  }
 0x554   :  { %v5813_v43 = vld [vmem:[#allocation9 + $0x8c] ss:$16 sps:$4 sm:$0xff]   ;;  %2322 = vmatprep.subr.bf16.mxu0 %v5810_v59  ;;  %6180 = vst [vmem:[#allocation48_spill] sm:$0xff] %v5837_v37 }
 0x555   :  { %v1823_v35 = vor.u32 %v1822_v20, %v5620_v3  ;;  %6176 = vst [vmem:[#allocation37_spill] sm:$0xff] %v5813_v43  ;;  %2363 = vmatprep.subr.bf16.mxu1 %v5813_v43  ;;  %v5828_v3 = vld [vmem:[#allocation9 + $0x60] ss:$16 sps:$4 sm:$0xff]  }
 0x556   :  { %v5840_v43 = vld [vmem:[#allocation9 + $0x40] ss:$16 sps:$4 sm:$0xff]  }
 0x557   :  { %v5767_v14 = vsel %vm5624_vm6, 2147483648, %v1823_v35  ;;  %v5816_v35 = vld [vmem:[#allocation9 + $0x80] ss:$16 sps:$4 sm:$0xff]  }
 0x558   :  { %v1826_v12 = vshra.s32 %v5767_v14, 16  ;;  %2323 = vmatpush1.bf16.msra.mxu0 %v5816_v35 }
 0x559   :  { %2324 = vmatprep.subr.bf16.mxu0 %v5822_v15 }
 0x55a   :  { %v5770_v6 = vcvt.s32.f32 %v1826_v12  ;;  %v5820_v12 = vld [vmem:[#allocation9 + $0x88] ss:$16 sps:$4 sm:$0xff]  }
 0x55b   :  { %6177 = vst [vmem:[#allocation45_spill] sm:$0xff] %v5820_v12  ;;  %2364 = vmatpush1.bf16.msra.mxu1 %v5820_v12  ;;  %v5846_v12 = vld [vmem:[#allocation9 + $0x24] ss:$16 sps:$4 sm:$0xff]  }
 0x55c   :  { %1829 = vmax.xlane.f32.xlu1 %v5770_v6  ;;  %2325 = vmatpush1.bf16.msra.mxu0 %v5828_v3 }
 0x55d   :  { %2326 = vmatprep.subr.bf16.mxu0 %v5834_v53 }
 0x560   :  { %2327 = vmatpush1.bf16.msra.mxu0 %v5840_v43 }
 0x561   :  { %2328 = vmatprep.subr.bf16.mxu0 %v5846_v12 }
 0x56d   :  { %v5796_v56 = vpop.f32.mrf.mxu1 }
 0x56f   :  { %v5801_v32 = vpop.f32.mrf.mxu1 }
 0x571   :  { %v2153_v30 = vpop.f32.mrf.mxu1 }
 0x572   :  { %v5825_v30 = vld [vmem:[#allocation9 + $0x6c] ss:$16 sps:$4 sm:$0xff]  }
 0x573   :  { %v2154_v20 = vpop.f32.mrf.mxu1  ;;  %6178 = vst [vmem:[#allocation46_spill] sm:$0xff] %v5825_v30  ;;  %2365 = vmatprep.subr.bf16.mxu1 %v5825_v30  ;;  %v5852_v30 = vld [vmem:[#allocation9 + $0x20] ss:$16 sps:$4 sm:$0xff]  }
 0x574   :  { %v5832_v20 = vld [vmem:[#allocation9 + $0x68] ss:$16 sps:$4 sm:$0xff]   ;;  %2329 = vmatpush1.bf16.msra.mxu0 %v5852_v30 }
 0x575   :  { %6179 = vst [vmem:[#allocation47_spill] sm:$0xff] %v5832_v20  ;;  %2366 = vmatpush1.bf16.msra.mxu1 %v5832_v20  ;;  %2330 = vmatprep.subr.bf16.mxu0 %v5863_v19 }
 0x576   :  { %2367 = vmatprep.subr.bf16.mxu1 %v5837_v37  ;;  %v1825_v37 = vand.u32 65535, %v5767_v14 }
 0x578   :  { %v1827_v25 = vcvt.s32.f32 %v1825_v37  ;;  %2331 = vmatpush1.bf16.msra.mxu0 %v5867_v18 }
 0x579   :  { %2368 = vmatpush1.bf16.msra.mxu1 %v5844_v29  ;;  %v5865_v29 = vld [vmem:[#allocation9 + $0xc] ss:$16 sps:$4 sm:$0xff]   ;;  %4499 = vmatprep.subr.bf16.mxu0 %v6147_v44 }
 0x57a   :  { %2369 = vmatprep.subr.bf16.mxu1 %v5849_v54 }
 0x57d   :  { %2370 = vmatpush1.bf16.msra.mxu1 %v5856_v46 }
 0x57e   :  { %2371 = vmatprep.subr.bf16.mxu1 %v5865_v29 }
 0x581   :  { %2372 = vmatpush1.bf16.msra.mxu1 %v5869_v17 }
 0x582   :  { %2790 = vmatprep.subr.bf16.mxu1 %v5640_v2  ;;  %v4808_v2 = vld [vmem:[#allocation12 + $0x38] sm:$0xff]  }
 0x5e5   :  { %v1830_v20 = vpop.xlane.xlu1 %1829 }
 0x5e6   :  { %vm1831_vm11 = vcmp.eq.f32.partialorder %v5770_v6, %v1830_v20  ;;  %v1836_v6 = vcvt.f32.s32 %v1830_v20  ;;  %v6184_v20 = vld [vmem:[#allocation32_spill] sm:$0xff] }
 0x5e7   :  { %v1832_v10 = vsel %vm1831_vm11, %v1827_v25, -inf }
 0x5e8   :  { %1833 = vmax.xlane.f32.xlu1 %v1832_v10  ;;  %v1837_v10 = vshll.u32 %v1836_v6, 16 }
 0x671   :  { %v1834_v25 = vpop.xlane.xlu1 %1833 }
 0x672   :  { %v1835_v37 = vcvt.f32.s32 %v1834_v25 }
 0x674   :  { %v1838_v46 = vadd.s32 %v1837_v10, %v1835_v37 }
 0x676   :  { %vm1839_vm12 = vcmp.eq.s32.totalorder %v5767_v14, %v1838_v46 }
 0x677   :  { %vm4239_vm13 = vmpackc.low %vm1839_vm12, %vm1839_vm12 }
 0x678   :  { %4240 = vmatmul.mubr.msk.bf16.vlgmr.msra.gmra.mxu0 %vm4239_vm13, %v6162_v36  ;;  %4242 = vmatmul.mubr.msk.bf16.vlgmr.msra.gmra.mxu1 %vm4239_vm13, %v6162_v36 }
 0x679   :  { %2791 = vmatpush1.bf16.msra.mxu1 %v5642_v38  ;;  %4515 = vmatprep.mubr.msk.bf16.mxu0 %vm5176_vm3, %v6147_v44  ;;  %v4809_v38 = vld [vmem:[#allocation12 + $0x30] sm:$0xff]  }
 0x67a   :  { %2792 = vmatprep.subr.bf16.mxu1 %v5647_v11  ;;  %2822 = vmatprep.mubr.bf16.mxu1 %v6129_v42  ;;  %v4810_v11 = vld [vmem:[#allocation12 + $0x28] sm:$0xff]  }
 0x67b   :  { %4500 = vmatpush3.bf16.msra.mxu0 %v4808_v2  ;;  %v6185_v2 = vld [vmem:[#allocation40_spill] sm:$0xff] }
 0x67c   :  { %4501 = vmatprep.subr.bf16.mxu0 %v6147_v44 }
 0x67d   :  { %2793 = vmatpush1.bf16.msra.mxu1 %v5649_v41  ;;  %v4811_v41 = vld [vmem:[#allocation12 + $0x20] sm:$0xff]  }
 0x67e   :  { %2794 = vmatprep.subr.bf16.mxu1 %v5654_v26  ;;  %v4812_v26 = vld [vmem:[#allocation12 + $0x18] sm:$0xff]  }
 0x67f   :  { %4502 = vmatpush3.bf16.msra.mxu0 %v4809_v38 }
 0x680   :  { %4503 = vmatprep.subr.bf16.mxu0 %v6147_v44 }
 0x681   :  { %2795 = vmatpush1.bf16.msra.mxu1 %v5656_v33  ;;  %v4813_v33 = vld [vmem:[#allocation12 + $0x10] sm:$0xff]  }
 0x682   :  { %2796 = vmatprep.subr.bf16.mxu1 %v5663_v40  ;;  %v4815_v40 = vld [vmem:[#allocation12] sm:$0xff]  }
 0x683   :  { %4504 = vmatpush3.bf16.msra.mxu0 %v4810_v11  ;;  %v6186_v11 = vld [vmem:[#allocation39_spill] sm:$0xff] }
 0x684   :  { %4505 = vmatprep.subr.bf16.mxu0 %v6147_v44 }
 0x685   :  { %2797 = vmatpush1.bf16.msra.mxu1 %v5661_v0  ;;  %v4814_v0 = vld [vmem:[#allocation12 + $0x8] sm:$0xff]  }
 0x686   :  { %2798 = vmatprep.subr.bf16.mxu1 %v5665_v55 }
 0x687   :  { %4506 = vmatpush3.bf16.msra.mxu0 %v4811_v41 }
 0x688   :  { %4507 = vmatprep.subr.bf16.mxu0 %v6147_v44 }
 0x689   :  { %2799 = vmatpush1.bf16.msra.mxu1 %v5670_v8 }
 0x68a   :  { %2800 = vmatprep.subr.bf16.mxu1 %v5673_v16 }
 0x68b   :  { %4508 = vmatpush3.bf16.msra.mxu0 %v4812_v26 }
 0x68c   :  { %4509 = vmatprep.subr.bf16.mxu0 %v6147_v44 }
 0x68d   :  { %2801 = vmatpush1.bf16.msra.mxu1 %v5677_v23 }
 0x68e   :  { %2802 = vmatprep.subr.bf16.mxu1 %v5680_v45 }
 0x68f   :  { %4510 = vmatpush3.bf16.msra.mxu0 %v4813_v33 }
 0x690   :  { %4511 = vmatprep.subr.bf16.mxu0 %v6147_v44 }
 0x691   :  { %2803 = vmatpush1.bf16.msra.mxu1 %v5684_v47  ;;  %v6183_v47 = vld [vmem:[#allocation31_spill] sm:$0xff] }
 0x692   :  { %2804 = vmatprep.subr.bf16.mxu1 %v5687_v48 }
 0x693   :  { %4512 = vmatpush3.bf16.msra.mxu0 %v4814_v0 }
 0x694   :  { %4513 = vmatprep.subr.bf16.mxu0 %v6147_v44 }
 0x695   :  { %2805 = vmatpush1.bf16.msra.mxu1 %v5691_v50 }
 0x696   :  { %3032 = vmatprep.subr.bf16.mxu1 %v5775_v4 }
 0x697   :  { %4514 = vmatpush3.bf16.msra.mxu0 %v4815_v40 }
 0x698   :  { %2831 = vmatprep.subr.bf16.mxu0 %v5693_v51 }
 0x738   :  { %v2350_v55 = vpop.f32.mrf.mxu0  ;;  %v2391_v8 = vpop.f32.mrf.mxu1 }
 0x739   :  { %v2351_v16 = vadd.f32 %v2350_v55, %v5759_v28  ;;  %v2392_v28 = vadd.f32 %v2391_v8, %v5796_v56 }
 0x73a   :  { %v2352_v23 = vpop.f32.mrf.mxu0  ;;  %v2393_v45 = vpop.f32.mrf.mxu1 }
 0x73b   :  { %v2398_v48 = vadd.f32 %v2351_v16, %v6183_v47  ;;  %v2353_v50 = vadd.f32 %v2352_v23, %v5762_v31  ;;  %v2394_v51 = vadd.f32 %v2393_v45, %v5801_v32  ;;  %v2400_v41 = vadd.f32 %v2392_v28, %v6186_v11 }
 0x73c   :  { %v2354_v14 = vpop.f32.mrf.mxu0  ;;  %v2395_v4 = vpop.f32.mrf.mxu1 }
 0x73d   :  { %v4243_v46 = vmul.f32 -1.442695, %v2398_v48  ;;  %v2399_v6 = vadd.f32 %v2353_v50, %v6184_v20  ;;  %v2401_v38 = vadd.f32 %v2394_v51, %v6185_v2 }
 0x73e   :  { %v2355_v25 = vpop.f32.mrf.mxu0  ;;  %v2396_v10 = vpop.f32.mrf.mxu1 }
 0x73f   :  { %4960 = vpow2.f32 %v4243_v46  ;;  %v4244_v37 = vmul.f32 -1.442695, %v2399_v6  ;;  %v4245_v26 = vmul.f32 -1.442695, %v2401_v38 }
 0x741   :  { %4962 = vpow2.f32 %v4244_v37 }
 0x742   :  { %4964 = vtanh.f32 %v2400_v41 }
 0x743   :  { %4966 = vpow2.f32 %v4245_v26 }
 0x74c   :  { %v4961_v31 = vpop.eup %4960 }
 0x74d   :  { %v2405_v33 = vadd.f32 1.0, %v4961_v31 }
 0x74e   :  { %v4963_v0 = vpop.eup %4962 }
 0x74f   :  { %4968 = vrcp.f32 %v2405_v33  ;;  %v2411_v40 = vadd.f32 1.0, %v4963_v0  ;;  %v4965_v55 = vpop.eup %4964 }
 0x750   :  { %v4967_v16 = vpop.eup %4966 }
 0x751   :  { %4970 = vrcp.f32 %v2411_v40  ;;  %v2418_v45 = vadd.f32 1.0, %v4967_v16  ;;  %v4819_v16 = vld [vmem:[#allocation11 + $0xe4] ss:$16 sps:$4 sm:$0xff]  }
 0x753   :  { %4972 = vrcp.f32 %v2418_v45  ;;  %v4821_v45 = vld [vmem:[#allocation11 + $0xc0] ss:$16 sps:$4 sm:$0xff]  }
 0x75c   :  { %v4969_v23 = vpop.eup %4968 }
 0x75d   :  { %v2422_v47 = vmul.f32 %v4969_v23, %v4965_v55  ;;  %v4816_v55 = vld [vmem:[#allocation12 + $0x38] sm:$0xff]   ;;  %v4817_v23 = vld [vmem:[#allocation11 + $0xe0] ss:$16 sps:$4 sm:$0xff]  }
 0x75e   :  { %v4971_v32 = vpop.eup %4970 }
 0x75f   :  { %v2421_v56 = vmul.f32 %v4971_v32, %v5707_v60  ;;  %v6188_v60 = vld [vmem:[#allocation25_spill] sm:$0xff] }
 0x760   :  { %v4973_v48 = vpop.eup %4972  ;;  %v4823_v32 = vld [vmem:[#allocation11 + $0xc4] ss:$16 sps:$4 sm:$0xff]  }
 0x761   :  { %v5916_v8 = vadd.f32 %v2422_v47, %v2421_v56  ;;  %v4820_v47 = vld [vmem:[#allocation12 + $0x30] sm:$0xff]   ;;  %v4824_v56 = vld [vmem:[#allocation12 + $0x28] sm:$0xff]  }
 0x763   :  { %4974 = vtanh.f32 %v5916_v8 }
 0x770   :  { %v4975_v50 = vpop.eup %4974 }
 0x771   :  { %v2425_v14 = vmul.f32 %v4975_v50, %v4973_v48  ;;  %v4827_v48 = vld [vmem:[#allocation11 + $0xa4] ss:$16 sps:$4 sm:$0xff]   ;;  %v4825_v50 = vld [vmem:[#allocation11 + $0xa0] ss:$16 sps:$4 sm:$0xff]  }
 0x773   :  { %v2426_v4 = vmul.f32 %v5556_v39, %v2425_v14  ;;  %v6187_v39 = vld [vmem:[#allocation24_spill] sm:$0xff]  ;;  %v4828_v14 = vld [vmem:[#allocation12 + $0x20] sm:$0xff]  }
 0x775   :  { %v2427_v46 = vpack.c.bf16 %v2426_v4, %v2426_v4  ;;  %v4829_v4 = vld [vmem:[#allocation11 + $0x80] ss:$16 sps:$4 sm:$0xff]  }
 0x777   :  { %4516 = vmatmul.mubr.bf16.vlgmr.msra.gmra.mxu0 %v2427_v46  ;;  %2823 = vmatmul.mubr.bf16.vlgmr.msra.gmra.mxu1 %v2427_v46 }
 0x778   :  { %2832 = vmatpush1.bf16.msra.mxu0 %v5711_v52  ;;  %2863 = vmatprep.mubr.bf16.mxu0 %v6129_v42  ;;  %v6192_v52 = vld [vmem:[#allocation20_spill] sm:$0xff] }
 0x779   :  { %2833 = vmatprep.subr.bf16.mxu0 %v5713_v57  ;;  %3033 = vmatpush1.bf16.msra.mxu1 %v5773_v27  ;;  %v6193_v57 = vld [vmem:[#allocation29_spill] sm:$0xff] }
 0x77a   :  { %3034 = vmatprep.subr.bf16.mxu1 %v5781_v24  ;;  %3064 = vmatprep.mubr.bf16.mxu1 %v6129_v42 }
 0x77c   :  { %2834 = vmatpush1.bf16.msra.mxu0 %v5716_v22  ;;  %v6194_v22 = vld [vmem:[#allocation30_spill] sm:$0xff] }
 0x77d   :  { %2835 = vmatprep.subr.bf16.mxu0 %v5720_v58  ;;  %3035 = vmatpush1.bf16.msra.mxu1 %v5788_v49  ;;  %v6195_v58 = vld [vmem:[#allocation38_spill] sm:$0xff] }
 0x77e   :  { %3036 = vmatprep.subr.bf16.mxu1 %v5794_v21 }
 0x780   :  { %2836 = vmatpush1.bf16.msra.mxu0 %v5724_v61  ;;  %v6196_v61 = vld [vmem:[#allocation37_spill] sm:$0xff] }
 0x781   :  { %2837 = vmatprep.subr.bf16.mxu0 %v5727_v62  ;;  %3037 = vmatpush1.bf16.msra.mxu1 %v5804_v34  ;;  %v6197_v62 = vld [vmem:[#allocation45_spill] sm:$0xff] }
 0x782   :  { %3038 = vmatprep.subr.bf16.mxu1 %v5810_v59 }
 0x784   :  { %2838 = vmatpush1.bf16.msra.mxu0 %v5730_v63  ;;  %v6198_v63 = vld [vmem:[#allocation46_spill] sm:$0xff] }
 0x785   :  { %2839 = vmatprep.subr.bf16.mxu0 %v5733_v1  ;;  %3039 = vmatpush1.bf16.msra.mxu1 %v5816_v35  ;;  %v6199_v1 = vld [vmem:[#allocation47_spill] sm:$0xff] }
 0x786   :  { %3040 = vmatprep.subr.bf16.mxu1 %v5822_v15  ;;  %v6189_v15 = vld [vmem:[#allocation26_spill] sm:$0xff] }
 0x788   :  { %2840 = vmatpush1.bf16.msra.mxu0 %v5736_v5  ;;  %v6200_v5 = vld [vmem:[#allocation48_spill] sm:$0xff] }
 0x789   :  { %2841 = vmatprep.subr.bf16.mxu0 %v5739_v7  ;;  %3041 = vmatpush1.bf16.msra.mxu1 %v5828_v3  ;;  %v6190_v3 = vld [vmem:[#allocation28_spill] sm:$0xff]  ;;  %v6201_v7 = vld [vmem:[#allocation49_spill] sm:$0xff] }
 0x78a   :  { %3042 = vmatprep.subr.bf16.mxu1 %v5834_v53  ;;  %v6191_v53 = vld [vmem:[#allocation27_spill] sm:$0xff] }
 0x78c   :  { %2842 = vmatpush1.bf16.msra.mxu0 %v5742_v9  ;;  %v6202_v9 = vld [vmem:[#allocation50_spill] sm:$0xff] }
 0x78d   :  { %2843 = vmatprep.subr.bf16.mxu0 %v5745_v13  ;;  %3043 = vmatpush1.bf16.msra.mxu1 %v5840_v43 }
 0x78e   :  { %3044 = vmatprep.subr.bf16.mxu1 %v5846_v12 }
 0x790   :  { %2844 = vmatpush1.bf16.msra.mxu0 %v6187_v39  ;;  %v4835_v39 = vld [vmem:[#allocation11 + $0x64] ss:$16 sps:$4 sm:$0xff]  }
 0x791   :  { %2845 = vmatprep.subr.bf16.mxu0 %v6188_v60  ;;  %3045 = vmatpush1.bf16.msra.mxu1 %v5852_v30  ;;  %v4832_v60 = vld [vmem:[#allocation12 + $0x18] sm:$0xff]  }
 0x792   :  { %3046 = vmatprep.subr.bf16.mxu1 %v5863_v19  ;;  %v6203_v19 = vld [vmem:[#allocation21_spill] sm:$0xff] }
 0x794   :  { %2846 = vmatpush1.bf16.msra.mxu0 %v6189_v15  ;;  %v4833_v15 = vld [vmem:[#allocation11 + $0x60] ss:$16 sps:$4 sm:$0xff]  }
 0x795   :  { %3073 = vmatprep.subr.bf16.mxu0 %v6190_v3  ;;  %3047 = vmatpush1.bf16.msra.mxu1 %v5867_v18  ;;  %v4839_v3 = vld [vmem:[#allocation11 + $0x44] ss:$16 sps:$4 sm:$0xff]  }
 0x796   :  { %4519 = vmatprep.subr.bf16.mxu1 %v6147_v44 }
 0x797   :  { %2864 = vmatmul.mubr.bf16.vlgmr.msra.gmra.mxu0 %v2427_v46  ;;  %v4831_v46 = vld [vmem:[#allocation11 + $0x84] ss:$16 sps:$4 sm:$0xff]  }
 0x798   :  { %3074 = vmatpush1.bf16.msra.mxu0 %v6191_v53  ;;  %3105 = vmatprep.mubr.bf16.mxu0 %v6129_v42  ;;  %v4836_v53 = vld [vmem:[#allocation12 + $0x10] sm:$0xff]  }
 0x799   :  { %3075 = vmatprep.subr.bf16.mxu0 %v6192_v52  ;;  %v4837_v52 = vld [vmem:[#allocation11 + $0x40] ss:$16 sps:$4 sm:$0xff]  }
 0x79c   :  { %3076 = vmatpush1.bf16.msra.mxu0 %v6193_v57  ;;  %v4843_v57 = vld [vmem:[#allocation11 + $0x24] ss:$16 sps:$4 sm:$0xff]  }
 0x79d   :  { %3077 = vmatprep.subr.bf16.mxu0 %v6194_v22  ;;  %v4840_v22 = vld [vmem:[#allocation12 + $0x8] sm:$0xff]  }
 0x7a0   :  { %3078 = vmatpush1.bf16.msra.mxu0 %v6195_v58  ;;  %v4841_v58 = vld [vmem:[#allocation11 + $0x20] ss:$16 sps:$4 sm:$0xff]  }
 0x7a1   :  { %3079 = vmatprep.subr.bf16.mxu0 %v6196_v61  ;;  %v4847_v61 = vld [vmem:[#allocation11 + $0x4] ss:$16 sps:$4 sm:$0xff]  }
 0x7a4   :  { %3080 = vmatpush1.bf16.msra.mxu0 %v6197_v62  ;;  %v4844_v62 = vld [vmem:[#allocation12] sm:$0xff]  }
 0x7a5   :  { %3081 = vmatprep.subr.bf16.mxu0 %v6198_v63  ;;  %v4845_v63 = vld [vmem:[#allocation11] ss:$16 sps:$4 sm:$0xff]  }
 0x7a8   :  { %3082 = vmatpush1.bf16.msra.mxu0 %v6199_v1  ;;  %v4850_v1 = vld [vmem:[#allocation11 + $0xec] ss:$16 sps:$4 sm:$0xff]  }
 0x7a9   :  { %3083 = vmatprep.subr.bf16.mxu0 %v6200_v5 }
 0x7ac   :  { %3084 = vmatpush1.bf16.msra.mxu0 %v6201_v7 }
 0x7ad   :  { %3085 = vmatprep.subr.bf16.mxu0 %v5849_v54 }
 0x7b0   :  { %3086 = vmatpush1.bf16.msra.mxu0 %v6202_v9 }
 0x7b1   :  { %3087 = vmatprep.subr.bf16.mxu0 %v5865_v29  ;;  %v6204_v29 = vld [vmem:[#allocation22_spill] sm:$0xff] }
 0x7b4   :  { %3088 = vmatpush1.bf16.msra.mxu0 %v5869_v17  ;;  %v4881_v17 = vld [vmem:[#allocation9 + $0xc8] ss:$16 sps:$4 sm:$0xff]  }
 0x7b5   :  { %3506 = vmatprep.subr.bf16.mxu0 %v4819_v16 }
 0x837   :  { %v2526_v13 = vpop.f32.mrf.mxu0  ;;  %v5970_v18 = vpop.f32.mrf.mxu1 }
 0x838   :  { %v2527_v27 = vadd.f32 %v6203_v19, %v2526_v13 }
 0x839   :  { %v4517_v24 = vpop.f32.mrf.mxu0  ;;  %v5973_v49 = vpop.f32.mrf.mxu1 }
 0x83a   :  { %2533 = vst [vmem:[#allocation14 + $0x10] sm:$0xff] %v2527_v27  ;;  %vm2535_vm14 = vcmp.lt.s32.totalorder %v2527_v27, 0  ;;  %v2536_v21 = vxor.u32 2147483647, %v2527_v27 }
 0x83b   :  { %v2529_v34 = vpop.f32.mrf.mxu0  ;;  %v2828_v59 = vpop.f32.mrf.mxu1 }
 0x83c   :  { %v2537_v54 = vsel %vm2535_vm14, %v2536_v21, %v2527_v27  ;;  %v6206_v27 = vld [vmem:[#allocation33_spill] sm:$0xff] }
 0x83d   :  { %v4518_v43 = vpop.f32.mrf.mxu0  ;;  %v2829_v35 = vpop.f32.mrf.mxu1  ;;  %v2538_v12 = vand.u32 4294967168, %v2537_v54 }
 0x83e   :  { %v6207_v43 = vld [vmem:[#allocation34_spill] sm:$0xff] }
 0x83f   :  { %v2539_v30 = vor.u32 %v2538_v12, %v6204_v29 }
 0x841   :  { %v2540_v20 = vsel %vm5624_vm6, 2147483648, %v2539_v30 }
 0x842   :  { %v2542_v6 = vshra.s32 %v2540_v20, 16  ;;  %v2541_v2 = vand.u32 65535, %v2540_v20 }
 0x844   :  { %v2544_v25 = vcvt.s32.f32 %v2542_v6  ;;  %v2543_v11 = vcvt.s32.f32 %v2541_v2 }
 0x846   :  { %2545 = vmax.xlane.f32.xlu0 %v2544_v25 }
 0x857   :  { %v5978_v10 = vpop.f32.mrf.mxu0 }
 0x859   :  { %v5980_v37 = vpop.f32.mrf.mxu0 }
 0x85b   :  { %v2869_v51 = vpop.f32.mrf.mxu0 }
 0x85d   :  { %v2870_v28 = vpop.f32.mrf.mxu0 }
 0x85e   :  { %v6209_v28 = vld [vmem:[#allocation41_spill] sm:$0xff] }
 0x8cf   :  { %v2546_v38 = vpop.xlane.xlu0 %2545 }
 0x8d0   :  { %vm2547_vm15 = vcmp.eq.f32.partialorder %v2544_v25, %v2546_v38  ;;  %v2552_v26 = vcvt.f32.s32 %v2546_v38  ;;  %v6208_v25 = vld [vmem:[#allocation42_spill] sm:$0xff] }
 0x8d1   :  { %v2548_v41 = vsel %vm2547_vm15, %v2543_v11, -inf }
 0x8d2   :  { %2549 = vmax.xlane.f32.xlu1 %v2548_v41  ;;  %v2553_v33 = vshll.u32 %v2552_v26, 16 }
 0x95b   :  { %v2550_v31 = vpop.xlane.xlu1 %2549 }
 0x95c   :  { %v2551_v0 = vcvt.f32.s32 %v2550_v31 }
 0x95e   :  { %v2554_v40 = vadd.s32 %v2553_v33, %v2551_v0 }
 0x960   :  { %vm2555_vm0 = vcmp.eq.s32.totalorder %v2540_v20, %v2554_v40 }
 0x961   :  { %vm4319_vm1 = vmpackc.low %vm2555_vm0, %vm2555_vm0 }
 0x962   :  { %4320 = vmatmul.mubr.msk.bf16.vlgmr.msra.gmra.mxu1 %vm4319_vm1, %v6162_v36  ;;  %4322 = vmatmul.mubr.msk.bf16.vlgmr.msra.gmra.mxu0 %vm4319_vm1, %v6162_v36 }
 0x963   :  { %4535 = vmatprep.mubr.msk.bf16.mxu1 %vm5176_vm3, %v6147_v44  ;;  %3538 = vmatprep.mubr.bf16.mxu0 %v6129_v42 }
 0x964   :  { %4520 = vmatpush3.bf16.msra.mxu1 %v4816_v55  ;;  %3507 = vmatpush1.bf16.msra.mxu0 %v4817_v23 }
 0x965   :  { %4521 = vmatprep.subr.bf16.mxu1 %v6147_v44  ;;  %3508 = vmatprep.subr.bf16.mxu0 %v4823_v32 }
 0x968   :  { %4522 = vmatpush3.bf16.msra.mxu1 %v4820_v47  ;;  %3509 = vmatpush1.bf16.msra.mxu0 %v4821_v45  ;;  %v6009_v45 = vld [vmem:[%s6077_s7] ss:$0 sm:$0xff] }
 0x969   :  { %4523 = vmatprep.subr.bf16.mxu1 %v6147_v44  ;;  %3510 = vmatprep.subr.bf16.mxu0 %v4827_v48  ;;  %v4848_v48 = vld [vmem:[#allocation11 + $0xe8] ss:$16 sps:$4 sm:$0xff]  }
 0x96c   :  { %4524 = vmatpush3.bf16.msra.mxu1 %v4824_v56  ;;  %3511 = vmatpush1.bf16.msra.mxu0 %v4825_v50 }
 0x96d   :  { %4525 = vmatprep.subr.bf16.mxu1 %v6147_v44  ;;  %3512 = vmatprep.subr.bf16.mxu0 %v4831_v46  ;;  %v4854_v46 = vld [vmem:[#allocation11 + $0xa8] ss:$16 sps:$4 sm:$0xff]  }
 0x970   :  { %4526 = vmatpush3.bf16.msra.mxu1 %v4828_v14  ;;  %3513 = vmatpush1.bf16.msra.mxu0 %v4829_v4  ;;  %v4853_v14 = vld [vmem:[#allocation11 + $0xcc] ss:$16 sps:$4 sm:$0xff]  }
 0x971   :  { %4527 = vmatprep.subr.bf16.mxu1 %v6147_v44  ;;  %3514 = vmatprep.subr.bf16.mxu0 %v4835_v39  ;;  %v4856_v4 = vld [vmem:[#allocation11 + $0xac] ss:$16 sps:$4 sm:$0xff]  }
 0x972   :  { %v4859_v39 = vld [vmem:[#allocation11 + $0x8c] ss:$16 sps:$4 sm:$0xff]  }
 0x974   :  { %4528 = vmatpush3.bf16.msra.mxu1 %v4832_v60  ;;  %3515 = vmatpush1.bf16.msra.mxu0 %v4833_v15  ;;  %v4857_v60 = vld [vmem:[#allocation11 + $0x88] ss:$16 sps:$4 sm:$0xff]   ;;  %v4862_v15 = vld [vmem:[#allocation11 + $0x6c] ss:$16 sps:$4 sm:$0xff]  }
 0x975   :  { %4529 = vmatprep.subr.bf16.mxu1 %v6147_v44  ;;  %3516 = vmatprep.subr.bf16.mxu0 %v4839_v3  ;;  %v4860_v3 = vld [vmem:[#allocation11 + $0x68] ss:$16 sps:$4 sm:$0xff]  }
 0x978   :  { %4530 = vmatpush3.bf16.msra.mxu1 %v4836_v53  ;;  %3517 = vmatpush1.bf16.msra.mxu0 %v4837_v52  ;;  %v4865_v53 = vld [vmem:[#allocation11 + $0x4c] ss:$16 sps:$4 sm:$0xff]   ;;  %v4863_v52 = vld [vmem:[#allocation11 + $0x48] ss:$16 sps:$4 sm:$0xff]  }
 0x979   :  { %4531 = vmatprep.subr.bf16.mxu1 %v6147_v44  ;;  %3518 = vmatprep.subr.bf16.mxu0 %v4843_v57  ;;  %v4868_v57 = vld [vmem:[#allocation11 + $0x2c] ss:$16 sps:$4 sm:$0xff]  }
 0x97c   :  { %4532 = vmatpush3.bf16.msra.mxu1 %v4840_v22  ;;  %3519 = vmatpush1.bf16.msra.mxu0 %v4841_v58  ;;  %v4866_v22 = vld [vmem:[#allocation11 + $0x28] ss:$16 sps:$4 sm:$0xff]   ;;  %v4871_v58 = vld [vmem:[#allocation11 + $0xc] ss:$16 sps:$4 sm:$0xff]  }
 0x97d   :  { %4533 = vmatprep.subr.bf16.mxu1 %v6147_v44  ;;  %3520 = vmatprep.subr.bf16.mxu0 %v4847_v61  ;;  %v4869_v61 = vld [vmem:[#allocation11 + $0x8] ss:$16 sps:$4 sm:$0xff]  }
 0x980   :  { %4534 = vmatpush3.bf16.msra.mxu1 %v4844_v62  ;;  %3521 = vmatpush1.bf16.msra.mxu0 %v4845_v63 }
 0x981   :  { %3547 = vmatprep.subr.bf16.mxu1 %v4850_v1  ;;  %v6020_v1 = vld [vmem:[%s6076_s6] ss:$0 sm:$0xff]  ;;  %s5177_s6 = smov [#allocation14]  }
 0x982   :  { %s3971_s21 = sshll.u32 %s5177_s6, 4  ;;  %s3972_s21 = int_to_ptr.vmem [resolvable:$true] %s3971_s21 }
 0x983   :  { %s5131_s22 = scalar_lea.vmem %s3972_s21, 640  ;;  %p5136_p3 = scmp.lt.s32.totalorder %s3972_s21, %s3972_s21 }
 0x984   :  { %p5132_p2 = scmp.ne.s32.totalorder %s3972_s21, %s5131_s22  ;;  %p5137_p4 = scmp.lt.s32.totalorder %s5131_s22, %s5131_s22 }
 0x986   :  { %p5138_p5 = por %p5137_p4, %p5136_p3 }
 0x988   :  { %p5139_p6 = pnand %p5138_p5, %p5132_p2 }
 0xa22   :  { %v3066_v5 = vpop.f32.mrf.mxu1  ;;  %v3107_v7 = vpop.f32.mrf.mxu0 }
 0xa23   :  { %v3067_v9 = vadd.f32 %v3066_v5, %v5970_v18  ;;  %v3108_v18 = vadd.f32 %v3107_v7, %v5978_v10 }
 0xa24   :  { %v3068_v13 = vpop.f32.mrf.mxu1  ;;  %v3109_v19 = vpop.f32.mrf.mxu0 }
 0xa25   :  { %v3114_v24 = vadd.f32 %v3067_v9, %v6206_v27  ;;  %v3069_v21 = vadd.f32 %v3068_v13, %v5973_v49  ;;  %v3110_v6 = vadd.f32 %v3109_v19, %v5980_v37  ;;  %v3116_v2 = vadd.f32 %v3108_v18, %v6209_v28  ;;  %v4880_v18 = vld [vmem:[#allocation9 + $0xc4] ss:$16 sps:$4 sm:$0xff]  }
 0xa26   :  { %v3070_v34 = vpop.f32.mrf.mxu1  ;;  %v3111_v59 = vpop.f32.mrf.mxu0 }
 0xa27   :  { %v4323_v54 = vmul.f32 -1.442695, %v3114_v24  ;;  %v3115_v35 = vadd.f32 %v3069_v21, %v6207_v43  ;;  %v3117_v51 = vadd.f32 %v3110_v6, %v6208_v25  ;;  %v4877_v6 = vld [vmem:[#allocation9 + $0xec] ss:$16 sps:$4 sm:$0xff]  }
 0xa28   :  { %v3071_v12 = vpop.f32.mrf.mxu1  ;;  %v3112_v30 = vpop.f32.mrf.mxu0  ;;  %v4883_v25 = vld [vmem:[#allocation9 + $0xcc] ss:$16 sps:$4 sm:$0xff]  }
 0xa29   :  { %4976 = vpow2.f32 %v4323_v54  ;;  %v4324_v20 = vmul.f32 -1.442695, %v3115_v35  ;;  %v4325_v38 = vmul.f32 -1.442695, %v3117_v51  ;;  %v4872_v12 = vld [vmem:[#allocation9 + $0xe0] ss:$16 sps:$4 sm:$0xff]  }
 0xa2a   :  { %v4874_v30 = vld [vmem:[#allocation9 + $0xe4] ss:$16 sps:$4 sm:$0xff]  }
 0xa2b   :  { %4978 = vpow2.f32 %v4324_v20  ;;  %v4875_v20 = vld [vmem:[#allocation9 + $0xe8] ss:$16 sps:$4 sm:$0xff]   ;;  %3748 = vmatprep.subr.bf16.mxu0 %v4874_v30  ;;  %v4886_v51 = vld [vmem:[#allocation9 + $0xa4] ss:$16 sps:$4 sm:$0xff]  }
 0xa2c   :  { %4980 = vtanh.f32 %v3116_v2  ;;  %v4889_v2 = vld [vmem:[#allocation9 + $0xac] ss:$16 sps:$4 sm:$0xff]  }
 0xa2d   :  { %4982 = vpow2.f32 %v4325_v38 }
 0xa36   :  { %v4977_v49 = vpop.eup %4976 }
 0xa37   :  { %v3121_v11 = vadd.f32 1.0, %v4977_v49  ;;  %v4884_v49 = vld [vmem:[#allocation9 + $0xa0] ss:$16 sps:$4 sm:$0xff]  }
 0xa38   :  { %v4979_v41 = vpop.eup %4978 }
 0xa39   :  { %4984 = vrcp.f32 %v3121_v11  ;;  %v3127_v26 = vadd.f32 1.0, %v4979_v41  ;;  %v4981_v31 = vpop.eup %4980  ;;  %v4887_v11 = vld [vmem:[#allocation9 + $0xa8] ss:$16 sps:$4 sm:$0xff]   ;;  %v4892_v41 = vld [vmem:[#allocation9 + $0x84] ss:$16 sps:$4 sm:$0xff]  }
 0xa3a   :  { %v4983_v33 = vpop.eup %4982 }
 0xa3b   :  { %4986 = vrcp.f32 %v3127_v26  ;;  %v3134_v55 = vadd.f32 1.0, %v4983_v33 }
 0xa3d   :  { %4988 = vrcp.f32 %v3134_v55  ;;  %v4901_v55 = vld [vmem:[#allocation9 + $0x6c] ss:$16 sps:$4 sm:$0xff]  }
 0xa46   :  { %v4985_v0 = vpop.eup %4984 }
 0xa47   :  { %v3138_v40 = vmul.f32 %v4985_v0, %v4981_v31  ;;  %v4895_v31 = vld [vmem:[#allocation9 + $0x8c] ss:$16 sps:$4 sm:$0xff]   ;;  %v4890_v0 = vld [vmem:[#allocation9 + $0x80] ss:$16 sps:$4 sm:$0xff]  }
 0xa48   :  { %v4987_v37 = vpop.eup %4986 }
 0xa49   :  { %v3137_v10 = vmul.f32 %v4987_v37, %v5916_v8  ;;  %v4851_v8 = vld [vmem:[#allocation11 + $0xc8] ss:$16 sps:$4 sm:$0xff]   ;;  %v4898_v37 = vld [vmem:[#allocation9 + $0x64] ss:$16 sps:$4 sm:$0xff]  }
 0xa4a   :  { %v4989_v23 = vpop.eup %4988 }
 0xa4b   :  { %v6003_v16 = vadd.f32 %v3138_v40, %v3137_v10  ;;  %v4893_v40 = vld [vmem:[#allocation9 + $0x88] ss:$16 sps:$4 sm:$0xff]   ;;  %v4896_v10 = vld [vmem:[#allocation9 + $0x60] ss:$16 sps:$4 sm:$0xff]  }
 0xa4d   :  { %4990 = vtanh.f32 %v6003_v16 }
 0xa5a   :  { %v4991_v47 = vpop.eup %4990 }
 0xa5b   :  { %v3141_v32 = vmul.f32 %v4991_v47, %v4989_v23  ;;  %v4899_v23 = vld [vmem:[#allocation9 + $0x68] ss:$16 sps:$4 sm:$0xff]   ;;  %v4904_v47 = vld [vmem:[#allocation9 + $0x44] ss:$16 sps:$4 sm:$0xff]  }
 0xa5d   :  { %v3142_v56 = vmul.f32 %v6009_v45, %v3141_v32  ;;  %v4907_v32 = vld [vmem:[#allocation9 + $0x4c] ss:$16 sps:$4 sm:$0xff]  }
 0xa5f   :  { %v3143_v50 = vpack.c.bf16 %v3142_v56, %v3142_v56  ;;  %v4902_v56 = vld [vmem:[#allocation9 + $0x40] ss:$16 sps:$4 sm:$0xff]  }
 0xa61   :  { %4536 = vmatmul.mubr.bf16.vlgmr.msra.gmra.mxu1 %v3143_v50  ;;  %3539 = vmatmul.mubr.bf16.vlgmr.msra.gmra.mxu0 %v3143_v50 }
 0xa62   :  { %3548 = vmatpush1.bf16.msra.mxu1 %v4848_v48  ;;  %3579 = vmatprep.mubr.bf16.mxu1 %v6129_v42  ;;  %v4905_v48 = vld [vmem:[#allocation9 + $0x48] ss:$16 sps:$4 sm:$0xff]  }
 0xa63   :  { %3549 = vmatprep.subr.bf16.mxu1 %v4853_v14  ;;  %3780 = vmatprep.mubr.bf16.mxu0 %v6129_v42  ;;  %v4913_v14 = vld [vmem:[#allocation9 + $0x2c] ss:$16 sps:$4 sm:$0xff]  }
 0xa64   :  { %3749 = vmatpush1.bf16.msra.mxu0 %v4872_v12  ;;  %v6210_v12 = vld [vmem:[#allocation35_spill] sm:$0xff] }
 0xa65   :  { %3750 = vmatprep.subr.bf16.mxu0 %v4880_v18 }
 0xa66   :  { %3550 = vmatpush1.bf16.msra.mxu1 %v4851_v8  ;;  %v4908_v8 = vld [vmem:[#allocation9 + $0x20] ss:$16 sps:$4 sm:$0xff]  }
 0xa67   :  { %3551 = vmatprep.subr.bf16.mxu1 %v4856_v4  ;;  %v4911_v4 = vld [vmem:[#allocation9 + $0x28] ss:$16 sps:$4 sm:$0xff]  }
 0xa6a   :  { %3552 = vmatpush1.bf16.msra.mxu1 %v4854_v46 }
 0xa6b   :  { %3553 = vmatprep.subr.bf16.mxu1 %v4859_v39 }
 0xa6e   :  { %3554 = vmatpush1.bf16.msra.mxu1 %v4857_v60 }
 0xa6f   :  { %3555 = vmatprep.subr.bf16.mxu1 %v4862_v15 }
 0xa72   :  { %3556 = vmatpush1.bf16.msra.mxu1 %v4860_v3  ;;  %v4916_v3 = vld [vmem:[#allocation9 + $0x4] ss:$16 sps:$4 sm:$0xff]  }
 0xa73   :  { %3557 = vmatprep.subr.bf16.mxu1 %v4865_v53  ;;  %v4919_v53 = vld [vmem:[#allocation9 + $0xc] ss:$16 sps:$4 sm:$0xff]  }
 0xa76   :  { %3558 = vmatpush1.bf16.msra.mxu1 %v4863_v52  ;;  %v4914_v52 = vld [vmem:[#allocation9] ss:$16 sps:$4 sm:$0xff]  }
 0xa77   :  { %3559 = vmatprep.subr.bf16.mxu1 %v4868_v57  ;;  %v4917_v57 = vld [vmem:[#allocation9 + $0x8] ss:$16 sps:$4 sm:$0xff]  }
 0xa7a   :  { %3560 = vmatpush1.bf16.msra.mxu1 %v4866_v22 }
 0xa7b   :  { %3561 = vmatprep.subr.bf16.mxu1 %v4871_v58 }
 0xa7e   :  { %3562 = vmatpush1.bf16.msra.mxu1 %v4869_v61 }
 0xa7f   :  { %3789 = vmatprep.subr.bf16.mxu1 %v4877_v6 }
 0xa81   :  { %3580 = vmatmul.mubr.bf16.vlgmr.msra.gmra.mxu1 %v3143_v50  ;;  %v4910_v50 = vld [vmem:[#allocation9 + $0x24] ss:$16 sps:$4 sm:$0xff]  }
 0xa82   :  { %3821 = vmatprep.mubr.bf16.mxu1 %v6129_v42  ;;  %3790 = vmatpush1.bf16.msra.mxu1 %v4875_v20 }
 0xa83   :  { %3791 = vmatprep.subr.bf16.mxu1 %v4883_v25 }
 0xa86   :  { %3792 = vmatpush1.bf16.msra.mxu1 %v4881_v17 }
 0xa87   :  { %3793 = vmatprep.subr.bf16.mxu1 %v4889_v2 }
 0xa8a   :  { %3794 = vmatpush1.bf16.msra.mxu1 %v4887_v11  ;;  %v6212_v11 = vld [vmem:[#allocation44_spill] sm:$0xff] }
 0xa8b   :  { %3795 = vmatprep.subr.bf16.mxu1 %v4895_v31 }
 0xa8e   :  { %3796 = vmatpush1.bf16.msra.mxu1 %v4893_v40 }
 0xa8f   :  { %3797 = vmatprep.subr.bf16.mxu1 %v4901_v55 }
 0xa92   :  { %3798 = vmatpush1.bf16.msra.mxu1 %v4899_v23 }
 0xa93   :  { %3799 = vmatprep.subr.bf16.mxu1 %v4907_v32 }
 0xa96   :  { %3800 = vmatpush1.bf16.msra.mxu1 %v4905_v48 }
 0xa97   :  { %3801 = vmatprep.subr.bf16.mxu1 %v4913_v14 }
 0xa9a   :  { %3802 = vmatpush1.bf16.msra.mxu1 %v4911_v4 }
 0xa9b   :  { %3803 = vmatprep.subr.bf16.mxu1 %v4919_v53 }
 0xa9e   :  { %3804 = vmatpush1.bf16.msra.mxu1 %v4917_v57 }
 0xb21   :  { %v3242_v62 = vpop.f32.mrf.mxu1  ;;  %v6015_v63 = vpop.f32.mrf.mxu0 }
 0xb22   :  { %v3243_v5 = vadd.f32 %v6020_v1, %v3242_v62 }
 0xb23   :  { %v4537_v7 = vpop.f32.mrf.mxu1  ;;  %v6023_v9 = vpop.f32.mrf.mxu0 }
 0xb24   :  { %3249 = vst [vmem:[#allocation14 + $0x18] sm:$0xff] %v3243_v5  ;;  %vm3251_vm2 = vcmp.lt.s32.totalorder %v3243_v5, 0  ;;  %v3252_v13 = vxor.u32 2147483647, %v3243_v5  ;;  %v4920_v7 = vld [vmem:[#allocation12 + $0x38] sm:$0xff]  }
 0xb25   :  { %v3245_v19 = vpop.f32.mrf.mxu1  ;;  %v3544_v27 = vpop.f32.mrf.mxu0 }
 0xb26   :  { %v3253_v24 = vsel %vm3251_vm2, %v3252_v13, %v3243_v5  ;;  %v4921_v13 = vld [vmem:[#allocation12 + $0x30] sm:$0xff]   ;;  %v4922_v19 = vld [vmem:[#allocation12 + $0x28] sm:$0xff]   ;;  %v4923_v27 = vld [vmem:[#allocation12 + $0x20] sm:$0xff]  }
 0xb27   :  { %v4538_v42 = vpop.f32.mrf.mxu1  ;;  %v3545_v21 = vpop.f32.mrf.mxu0  ;;  %v3254_v34 = vand.u32 4294967168, %v3253_v24  ;;  %v4924_v24 = vld [vmem:[#allocation12 + $0x18] sm:$0xff]  }
 0xb28   :  { %v4926_v42 = vld [vmem:[#allocation12 + $0x8] sm:$0xff]   ;;  %v4927_v21 = vld [vmem:[#allocation12] sm:$0xff]  }
 0xb29   :  { %v3255_v59 = vor.u32 %v3254_v34, %v6204_v29  ;;  %v4878_v29 = vld [vmem:[#allocation9 + $0xc0] ss:$16 sps:$4 sm:$0xff]  }
 0xb2a   :  { %3751 = vmatpush1.bf16.msra.mxu0 %v4878_v29  ;;  %v6211_v29 = vld [vmem:[#allocation36_spill] sm:$0xff] }
 0xb2b   :  { %v6028_v54 = vsel %vm5624_vm6, 2147483648, %v3255_v59  ;;  %3752 = vmatprep.subr.bf16.mxu0 %v4886_v51 }
 0xb2c   :  { %v3258_v43 = vshra.s32 %v6028_v54, 16  ;;  %v3257_v46 = vand.u32 65535, %v6028_v54 }
 0xb2e   :  { %v6031_v35 = vcvt.s32.f32 %v3258_v43  ;;  %3753 = vmatpush1.bf16.msra.mxu0 %v4884_v49  ;;  %v3259_v60 = vcvt.s32.f32 %v3257_v46 }
 0xb2f   :  { %3754 = vmatprep.subr.bf16.mxu0 %v4892_v41 }
 0xb30   :  { %3261 = vmax.xlane.f32.xlu0 %v6031_v35 }
 0xb32   :  { %3755 = vmatpush1.bf16.msra.mxu0 %v4890_v0 }
 0xb33   :  { %3756 = vmatprep.subr.bf16.mxu0 %v4898_v37 }
 0xb36   :  { %3757 = vmatpush1.bf16.msra.mxu0 %v4896_v10 }
 0xb37   :  { %3758 = vmatprep.subr.bf16.mxu0 %v4904_v47 }
 0xb3a   :  { %3759 = vmatpush1.bf16.msra.mxu0 %v4902_v56 }
 0xb3b   :  { %3760 = vmatprep.subr.bf16.mxu0 %v4910_v50 }
 0xb3e   :  { %3761 = vmatpush1.bf16.msra.mxu0 %v4908_v8 }
 0xb3f   :  { %3762 = vmatprep.subr.bf16.mxu0 %v4916_v3 }
 0xb41   :  { %v6034_v28 = vpop.f32.mrf.mxu1 }
 0xb42   :  { %3763 = vmatpush1.bf16.msra.mxu0 %v4914_v52 }
 0xb43   :  { %v6036_v38 = vpop.f32.mrf.mxu1  ;;  %4539 = vmatprep.subr.bf16.mxu0 %v6147_v44 }
 0xb45   :  { %v3585_v26 = vpop.f32.mrf.mxu1 }
 0xb46   :  { %v6213_v26 = vld [vmem:[#allocation43_spill] sm:$0xff] }
 0xb47   :  { %v3586_v33 = vpop.f32.mrf.mxu1 }
 0xbb9   :  { %v3262_v39 = vpop.xlane.xlu0 %3261 }
 0xbba   :  { %vm3263_vm4 = vcmp.eq.f32.partialorder %v6031_v35, %v3262_v39  ;;  %v3268_v22 = vcvt.f32.s32 %v3262_v39 }
 0xbbb   :  { %v3264_v15 = vsel %vm3263_vm4, %v3259_v60, -inf }
 0xbbc   :  { %3265 = vmax.xlane.f32.xlu1 %v3264_v15  ;;  %v3269_v61 = vshll.u32 %v3268_v22, 16 }
 0xc45   :  { %v3266_v58 = vpop.xlane.xlu1 %3265 }
 0xc46   :  { %v3267_v62 = vcvt.f32.s32 %v3266_v58 }
 0xc48   :  { %v3270_v5 = vadd.s32 %v3269_v61, %v3267_v62 }
 0xc4a   :  { %vm3271_vm5 = vcmp.eq.s32.totalorder %v6028_v54, %v3270_v5 }
 0xc4b   :  { %vm4399_vm6 = vmpackc.low %vm3271_vm5, %vm3271_vm5 }
 0xc4c   :  { %4400 = vmatmul.mubr.msk.bf16.vlgmr.msra.gmra.mxu0 %vm4399_vm6, %v6162_v36  ;;  %4402 = vmatmul.mubr.msk.bf16.vlgmr.msra.gmra.mxu1 %vm4399_vm6, %v6162_v36  ;;  %v4925_v36 = vld [vmem:[#allocation12 + $0x10] sm:$0xff]  }
 0xc4d   :  { %4555 = vmatprep.mubr.msk.bf16.mxu0 %vm5176_vm3, %v6147_v44  ;;  %4540 = vmatpush3.bf16.msra.mxu0 %v4920_v7 }
 0xc4e   :  { %4541 = vmatprep.subr.bf16.mxu0 %v6147_v44 }
 0xc51   :  { %4542 = vmatpush3.bf16.msra.mxu0 %v4921_v13 }
 0xc52   :  { %4543 = vmatprep.subr.bf16.mxu0 %v6147_v44 }
 0xc55   :  { %4544 = vmatpush3.bf16.msra.mxu0 %v4922_v19 }
 0xc56   :  { %4545 = vmatprep.subr.bf16.mxu0 %v6147_v44 }
 0xc59   :  { %4546 = vmatpush3.bf16.msra.mxu0 %v4923_v27 }
 0xc5a   :  { %4547 = vmatprep.subr.bf16.mxu0 %v6147_v44 }
 0xc5d   :  { %4548 = vmatpush3.bf16.msra.mxu0 %v4924_v24 }
 0xc5e   :  { %4549 = vmatprep.subr.bf16.mxu0 %v6147_v44 }
 0xc61   :  { %4550 = vmatpush3.bf16.msra.mxu0 %v4925_v36 }
 0xc62   :  { %4551 = vmatprep.subr.bf16.mxu0 %v6147_v44 }
 0xc65   :  { %4552 = vmatpush3.bf16.msra.mxu0 %v4926_v42 }
 0xc66   :  { %4553 = vmatprep.subr.bf16.mxu0 %v6147_v44 }
 0xc69   :  { %4554 = vmatpush3.bf16.msra.mxu0 %v4927_v21 }
 0xd0c   :  { %v3782_v34 = vpop.f32.mrf.mxu0  ;;  %v3823_v59 = vpop.f32.mrf.mxu1 }
 0xd0d   :  { %v3783_v54 = vadd.f32 %v3782_v34, %v6015_v63  ;;  %v3824_v63 = vadd.f32 %v3823_v59, %v6034_v28 }
 0xd0e   :  { %v3784_v43 = vpop.f32.mrf.mxu0  ;;  %v3825_v35 = vpop.f32.mrf.mxu1 }
 0xd0f   :  { %v3830_v30 = vadd.f32 %v3783_v54, %v6210_v12  ;;  %v3785_v20 = vadd.f32 %v3784_v43, %v6023_v9  ;;  %v3826_v49 = vadd.f32 %v3825_v35, %v6036_v38  ;;  %v3832_v31 = vadd.f32 %v3824_v63, %v6213_v26 }
 0xd10   :  { %v3786_v6 = vpop.f32.mrf.mxu0  ;;  %v3827_v18 = vpop.f32.mrf.mxu1 }
 0xd11   :  { %v4403_v25 = vmul.f32 -1.442695, %v3830_v30  ;;  %v3831_v17 = vadd.f32 %v3785_v20, %v6211_v29  ;;  %v3833_v41 = vadd.f32 %v3826_v49, %v6212_v11 }
 0xd12   :  { %v3787_v51 = vpop.f32.mrf.mxu0  ;;  %v3828_v2 = vpop.f32.mrf.mxu1 }
 0xd13   :  { %4992 = vpow2.f32 %v4403_v25  ;;  %v4404_v44 = vmul.f32 -1.442695, %v3831_v17  ;;  %v4405_v33 = vmul.f32 -1.442695, %v3833_v41 }
 0xd15   :  { %4994 = vpow2.f32 %v4404_v44 }
 0xd16   :  { %4996 = vtanh.f32 %v3832_v31 }
 0xd17   :  { %4998 = vpow2.f32 %v4405_v33 }
 0xd20   :  { %v4993_v9 = vpop.eup %4992 }
 0xd21   :  { %v3837_v0 = vadd.f32 1.0, %v4993_v9 }
 0xd22   :  { %v4995_v40 = vpop.eup %4994 }
 0xd23   :  { %5000 = vrcp.f32 %v3837_v0  ;;  %v3843_v37 = vadd.f32 1.0, %v4995_v40  ;;  %v4997_v55 = vpop.eup %4996 }
 0xd24   :  { %v4999_v10 = vpop.eup %4998 }
 0xd25   :  { %5002 = vrcp.f32 %v3843_v37  ;;  %v3850_v32 = vadd.f32 1.0, %v4999_v10 }
 0xd27   :  { %5004 = vrcp.f32 %v3850_v32 }
 0xd30   :  { %v5001_v23 = vpop.eup %5000 }
 0xd31   :  { %v3854_v47 = vmul.f32 %v5001_v23, %v4997_v55 }
 0xd32   :  { %v5003_v38 = vpop.eup %5002 }
 0xd33   :  { %v3853_v28 = vmul.f32 %v5003_v38, %v6003_v16 }
 0xd34   :  { %v5005_v48 = vpop.eup %5004 }
 0xd35   :  { %v3855_v56 = vadd.f32 %v3854_v47, %v3853_v28 }
 0xd37   :  { %5006 = vtanh.f32 %v3855_v56 }
 0xd44   :  { %v5007_v50 = vpop.eup %5006 }
 0xd45   :  { %v3857_v14 = vmul.f32 %v5007_v50, %v5005_v48 }
 0xd47   :  { %v3858_v8 = vmul.f32 %v6009_v45, %v3857_v14 }
 0xd49   :  { %v3859_v4 = vpack.c.bf16 %v3858_v8, %v3858_v8 }
 0xd4b   :  { %4556 = vmatmul.mubr.bf16.vlgmr.msra.gmra.mxu0 %v3859_v4 }
 0xe0b   :  { %v3958_v46 = vpop.f32.mrf.mxu0 }
 0xe0c   :  { %v3959_v39 = vadd.f32 %v6020_v1, %v3958_v46 }
 0xe0d   :  { %v4557_v60 = vpop.f32.mrf.mxu0 }
 0xe0e   :  { %3965 = vst [vmem:[#allocation14 + $0x20] sm:$0xff] %v3959_v39 }
 0xe0f   :  { %v3961_v15 = vpop.f32.mrf.mxu0 }
 0xe10   :  { %5142 = shalt.err (!%p5139_p6)
}
 0xe11   :  { %3977 = dma.vmem_to_hbm [thread:$0]  %s3972_s21, 640, %s6078_s8, [#allocation5], %s5166_s19, %s5166_s19, %s5167_s20   ;;  %v4558_v16 = vpop.f32.mrf.mxu0 }
 0xe12   :  { %5159 = dma.done.wait [#allocation5], 640  }
 0xe13   :  { %5160 = vsyncadd [#allocation5], 4294966656 }
 0xe14   :  { %3981 = vsyncpa [#allocation4], 1 }
 0xe15   :  { %3982 = vsyncpa [#allocation7], 1 }
 0xe16   :  { %3983 = vsyncpa [#allocation10], 1 }
 0xe17   :  { %3984 = vsyncpa [#allocation13], 1 }
 0xe18   :  { %3985 = vsyncpa [#allocation5], 1 }

</bundles_post_ra>
